<compile_context>
chip_gen: v5e
topology: v5e:2x2
jax: 0.10.0
libtpu: 0.0.40
codegen_flags: <defaults>
</compile_context>

<pallas_src>
import functools

import jax
import jax.numpy as jnp
from jax import lax
from jax.experimental import pallas as pl
from jax.experimental.pallas import tpu as pltpu


# ---------------------------------------------------------------------------
# Kernels
# ---------------------------------------------------------------------------
def _feature_kernel(xp_ref, w1_ref, t1_ref, w2_ref, t2_ref, feat_ref,
                    *, T, K1, K2):
    """Per-batch-tile feature extractor: conv->BN->ReLU x2 -> global avg pool."""
    TB = xp_ref.shape[0]
    c_in = xp_ref.shape[-1]
    c1 = w1_ref.shape[-1]
    c2 = w2_ref.shape[-1]

    xp = xp_ref[...]                                  # (TB, T+K1-1, c_in)

    # ---- conv1 as one im2col matmul: (TB*T, K1*c_in) x (K1*c_in, c1) ----
    cols1 = jnp.concatenate([xp[:, k:k + T, :] for k in range(K1)], axis=-1)
    h1 = jnp.dot(cols1.reshape(TB * T, K1 * c_in), w1_ref[...],
                 preferred_element_type=jnp.float32)
    h1 = jnp.maximum(h1 + t1_ref[...], 0.0).reshape(TB, T, c1)   # BN+bias folded

    # ---- 'same' padding for conv2, kept in registers (no scratch roundtrip) --
    pad_l = (K2 - 1) // 2
    pad_r = K2 - 1 - pad_l
    h1p = jnp.concatenate(
        [jnp.zeros((TB, pad_l, c1), jnp.float32),
         h1,
         jnp.zeros((TB, pad_r, c1), jnp.float32)], axis=1)       # (TB, T+K2-1, c1)

    # ---- conv2 as one im2col matmul: (TB*T, K2*c1) x (K2*c1, c2) ----
    cols2 = jnp.concatenate([h1p[:, k:k + T, :] for k in range(K2)], axis=-1)
    h2 = jnp.dot(cols2.reshape(TB * T, K2 * c1), w2_ref[...],
                 preferred_element_type=jnp.float32)
    h2 = jnp.maximum(h2 + t2_ref[...], 0.0).reshape(TB, T, c2)

    # ---- AdaptiveAvgPool1d(1): mean over time -> lane-dense (TB, c2) output --
    feat_ref[...] = jnp.mean(h2, axis=1)


def _head_kernel(feat_ref, w1_ref, b1_ref, w2_ref, b2_ref, w3_ref, b3_ref,
                 out_ref):
    """ThreeLayersDecoder with dropout p=0: Linear-ReLU-Linear-ReLU-Linear."""
    z = jnp.maximum(
        jnp.dot(feat_ref[...], w1_ref[...],
                preferred_element_type=jnp.float32) + b1_ref[...], 0.0)
    z = jnp.maximum(
        jnp.dot(z, w2_ref[...],
                preferred_element_type=jnp.float32) + b2_ref[...], 0.0)
    out_ref[...] = (jnp.dot(z, w3_ref[...],
                            preferred_element_type=jnp.float32) + b3_ref[...])


# ---------------------------------------------------------------------------
# Wrapper
# ---------------------------------------------------------------------------
def _pick_batch_tile(B, T, c_in, c1, c2, K1, K2,
                     vmem_budget_bytes=24 * 1024 * 1024):
    """Largest batch tile that (a) divides B, (b) is 8-aligned, (c) fits a
    conservative VMEM budget (sized for v7x's 64 MiB per-TC VMEM)."""
    def tile_bytes(tb):
        words = tb * ((T + K1 - 1) * c_in       # xp tile
                      + T * K1 * c_in           # cols1
                      + (T + K2 - 1) * c1       # h1p
                      + T * K2 * c1             # cols2
                      + T * c2                  # h2
                      + c2)                     # feat
        return 4 * 2 * words                    # f32, x2 for double buffering
    for tb in (128, 64, 32, 16, 8):
        if B % tb == 0 and tile_bytes(tb) <= vmem_budget_bytes:
            return tb
    return B  # full-batch block (block dims equal array dims -> always legal)


def codats_f_c_forward(x, params, *, K1=8, K2=5, tb=None):
    """x: (B, C_in, T) float32 in PyTorch NCL layout. Returns (B, 1) logits."""
    B, c_in, T = x.shape
    c1 = params["t1"].shape[-1]
    c2 = params["t2"].shape[-1]
    n_out = params["fc3b"].shape[-1]

    # channels-last + explicit 'same' padding for conv1 (PyTorch: left=(K-1)//2).
    x_cl = jnp.transpose(x, (0, 2, 1))
    pad_l1 = (K1 - 1) // 2
    xp = jnp.pad(x_cl, ((0, 0), (pad_l1, K1 - 1 - pad_l1), (0, 0)))
    Tp1 = T + K1 - 1

    if tb is None:
        tb = _pick_batch_tile(B, T, c_in, c1, c2, K1, K2)
    assert B % tb == 0, (B, tb)
    grid = (B // tb,)

    w1, t1 = params["w1"], params["t1"]          # (K1*c_in, c1), (1, c1)
    w2, t2 = params["w2"], params["t2"]          # (K2*c1, c2), (1, c2)

    flops = 2 * B * T * (K1 * c_in * c1 + K2 * c1 * c2)
    bytes_accessed = 4 * (xp.size + B * c2 + w1.size + w2.size + t1.size + t2.size)

    feat = pl.pallas_call(
        functools.partial(_feature_kernel, T=T, K1=K1, K2=K2),
        out_shape=jax.ShapeDtypeStruct((B, c2), jnp.float32),
        grid=grid,
        in_specs=[
            pl.BlockSpec((tb, Tp1, c_in), lambda i: (i, 0, 0)),   # x: batch-tiled
            pl.BlockSpec(w1.shape, lambda i: (0, 0)),             # weights resident
            pl.BlockSpec(t1.shape, lambda i: (0, 0)),
            pl.BlockSpec(w2.shape, lambda i: (0, 0)),
            pl.BlockSpec(t2.shape, lambda i: (0, 0)),
        ],
        out_specs=pl.BlockSpec((tb, c2), lambda i: (i, 0)),       # lane-dense feat
        compiler_params=pltpu.CompilerParams(
            dimension_semantics=("parallel",),
            vmem_limit_bytes=32 * 1024 * 1024),
        cost_estimate=pl.CostEstimate(flops=flops, transcendentals=0,
                                      bytes_accessed=bytes_accessed),
    )(xp, w1, t1, w2, t2)

    # Tiny MLP head: negligible FLOPs, run once over the whole batch.
    vmem = pl.BlockSpec(memory_space=pltpu.MemorySpace.VMEM)
    out = pl.pallas_call(
        _head_kernel,
        out_shape=jax.ShapeDtypeStruct((B, n_out), jnp.float32),
        in_specs=[vmem] * 7,
        out_specs=vmem,
    )(feat, params["fc1w"], params["fc1b"], params["fc2w"], params["fc2b"],
      params["fc3w"], params["fc3b"])
    return out


# ---------------------------------------------------------------------------
# Parameter init (PyTorch layouts) + conversion to kernel layout
# ---------------------------------------------------------------------------
def _init_params(key):
    ks = jax.random.split(key, 20)
    eps = 1e-5
    # PyTorch-layout tensors
    w1_pt = 0.1 * jax.random.normal(ks[0], (64, 3, 8), jnp.float32)    # (O,I,K)
    b1_pt = 0.05 * jax.random.normal(ks[1], (64,), jnp.float32)
    w2_pt = 0.1 * jax.random.normal(ks[2], (128, 64, 5), jnp.float32)
    b2_pt = 0.05 * jax.random.normal(ks[3], (128,), jnp.float32)
    fc1_pt = 0.1 * jax.random.normal(ks[4], (50, 128), jnp.float32)    # (out,in)
    fc1b = 0.05 * jax.random.normal(ks[5], (50,), jnp.float32)
    fc2_pt = 0.1 * jax.random.normal(ks[6], (10, 50), jnp.float32)
    fc2b = 0.05 * jax.random.normal(ks[7], (10,), jnp.float32)
    fc3_pt = 0.1 * jax.random.normal(ks[8], (1, 10), jnp.float32)
    fc3b = 0.05 * jax.random.normal(ks[9], (1,), jnp.float32)

    # BatchNorm eval-mode parameters / running statistics.
    g1 = 1.0 + 0.1 * jax.random.normal(ks[10], (64,), jnp.float32)
    be1 = 0.1 * jax.random.normal(ks[11], (64,), jnp.float32)
    m1 = 0.1 * jax.random.normal(ks[12], (64,), jnp.float32)
    v1 = 0.5 + jax.random.uniform(ks[13], (64,), jnp.float32)
    g2 = 1.0 + 0.1 * jax.random.normal(ks[14], (128,), jnp.float32)
    be2 = 0.1 * jax.random.normal(ks[15], (128,), jnp.float32)
    m2 = 0.1 * jax.random.normal(ks[16], (128,), jnp.float32)
    v2 = 0.5 + jax.random.uniform(ks[17], (128,), jnp.float32)

    s1 = g1 / jnp.sqrt(v1 + eps)
    t1 = be1 - s1 * m1            # BN(y) = s*y + t, with y = conv(x) + bias
    s2 = g2 / jnp.sqrt(v2 + eps)
    t2 = be2 - s2 * m2

    # Kernel layout: im2col weights (K*C_in, C_out) with BN scale + bias folded.
    w1f = jnp.transpose(w1_pt, (2, 1, 0)) * s1[None, None, :]          # (K,I,O)
    w2f = jnp.transpose(w2_pt, (2, 1, 0)) * s2[None, None, :]
    kernel_params = dict(
        w1=w1f.reshape(8 * 3, 64), t1=(s1 * b1_pt + t1).reshape(1, -1),
        w2=w2f.reshape(5 * 64, 128), t2=(s2 * b2_pt + t2).reshape(1, -1),
        fc1w=fc1_pt.T, fc1b=fc1b.reshape(1, -1),
        fc2w=fc2_pt.T, fc2b=fc2b.reshape(1, -1),
        fc3w=fc3_pt.T, fc3b=fc3b.reshape(1, -1),
    )
    pt_params = dict(w1=w1_pt, b1=b1_pt, w2=w2_pt, b2=b2_pt,
                     s1=s1, t1=t1, s2=s2, t2=t2,
                     fc1=fc1_pt, fc1b=fc1b, fc2=fc2_pt, fc2b=fc2b,
                     fc3=fc3_pt, fc3b=fc3b)
    return kernel_params, pt_params


def _ref_forward(x, p):
    """Independent pure-JAX reference using lax.conv (PyTorch NCL semantics)."""
    dn = ("NCH", "OIH", "NCH")
    h = lax.conv_general_dilated(x, p["w1"], (1,), [(3, 4)],
                                 dimension_numbers=dn) + p["b1"][None, :, None]
    h = jnp.maximum(h * p["s1"][None, :, None] + p["t1"][None, :, None], 0.0)
    h = lax.conv_general_dilated(h, p["w2"], (1,), [(2, 2)],
                                 dimension_numbers=dn) + p["b2"][None, :, None]
    h = jnp.maximum(h * p["s2"][None, :, None] + p["t2"][None, :, None], 0.0)
    feat = jnp.mean(h, axis=-1)                       # (B, 128)
    z = jnp.maximum(feat @ p["fc1"].T + p["fc1b"], 0.0)
    z = jnp.maximum(z @ p["fc2"].T + p["fc2b"], 0.0)
    return z @ p["fc3"].T + p["fc3b"]


if __name__ == "__main__":
    B, C_IN, T = 16, 3, 16
    key = jax.random.PRNGKey(0)
    kx, kp = jax.random.split(key)
    x = jax.random.normal(kx, (B, C_IN, T), jnp.float32)   # PyTorch NCL layout

    kernel_params, pt_params = _init_params(kp)

    # tb=8 -> grid=(2,): exercises the batch-parallel, pipelined grid path.
    out = codats_f_c_forward(x, kernel_params, tb=8)
    out = jax.block_until_ready(out)

    ref = _ref_forward(x, pt_params)
    assert out.shape == (B, 1), out.shape
    assert jnp.allclose(out, ref, atol=2e-4, rtol=2e-4), (out, ref)

    print("KERNEL_OK")
</pallas_src>

<mosaic_0001>
module attributes {stable_mosaic.version = 11 : i64} {
  func.func @_feature_kernel(%arg0: i32, %arg1: memref<8x23x3xf32, #tpu.memory_space<vmem>>, %arg2: memref<24x64xf32, #tpu.memory_space<vmem>>, %arg3: memref<1x64xf32, #tpu.memory_space<vmem>>, %arg4: memref<320x128xf32, #tpu.memory_space<vmem>>, %arg5: memref<1x128xf32, #tpu.memory_space<vmem>>, %arg6: memref<8x128xf32, #tpu.memory_space<vmem>>) attributes {dimension_semantics = [#tpu.dimension_semantics<parallel>], iteration_bounds = array<i64: 2>, scalar_prefetch = 0 : i64, scratch_operands = 0 : i64, tpu.core_type = #tpu.core_type<tc>, window_params = [{transform_indices = @transform_0, window_bounds = array<i64: 8, 23, 3>}, {pipeline_mode = #tpu.pipeline_mode<synchronous>, transform_indices = @transform_1, window_bounds = array<i64: 24, 64>}, {pipeline_mode = #tpu.pipeline_mode<synchronous>, transform_indices = @transform_2, window_bounds = array<i64: 1, 64>}, {pipeline_mode = #tpu.pipeline_mode<synchronous>, transform_indices = @transform_3, window_bounds = array<i64: 320, 128>}, {pipeline_mode = #tpu.pipeline_mode<synchronous>, transform_indices = @transform_4, window_bounds = array<i64: 1, 128>}, {transform_indices = @transform_5, window_bounds = array<i64: 8, 128>}]} {
    %c0 = arith.constant 0 : index
    %c0_0 = arith.constant 0 : index
    %c0_1 = arith.constant 0 : index
    %0 = vector.load %arg1[%c0, %c0_0, %c0_1] : memref<8x23x3xf32, #tpu.memory_space<vmem>>, vector<8x23x3xf32>
    %1 = vector.extract_strided_slice %0 {offsets = [0, 0, 0], sizes = [8, 16, 3], strides = [1, 1, 1]} : vector<8x23x3xf32> to vector<8x16x3xf32>
    %2 = vector.extract_strided_slice %0 {offsets = [0, 1, 0], sizes = [8, 16, 3], strides = [1, 1, 1]} : vector<8x23x3xf32> to vector<8x16x3xf32>
    %3 = vector.extract_strided_slice %0 {offsets = [0, 2, 0], sizes = [8, 16, 3], strides = [1, 1, 1]} : vector<8x23x3xf32> to vector<8x16x3xf32>
    %4 = vector.extract_strided_slice %0 {offsets = [0, 3, 0], sizes = [8, 16, 3], strides = [1, 1, 1]} : vector<8x23x3xf32> to vector<8x16x3xf32>
    %5 = vector.extract_strided_slice %0 {offsets = [0, 4, 0], sizes = [8, 16, 3], strides = [1, 1, 1]} : vector<8x23x3xf32> to vector<8x16x3xf32>
    %6 = vector.extract_strided_slice %0 {offsets = [0, 5, 0], sizes = [8, 16, 3], strides = [1, 1, 1]} : vector<8x23x3xf32> to vector<8x16x3xf32>
    %7 = vector.extract_strided_slice %0 {offsets = [0, 6, 0], sizes = [8, 16, 3], strides = [1, 1, 1]} : vector<8x23x3xf32> to vector<8x16x3xf32>
    %8 = vector.extract_strided_slice %0 {offsets = [0, 7, 0], sizes = [8, 16, 3], strides = [1, 1, 1]} : vector<8x23x3xf32> to vector<8x16x3xf32>
    %9 = tpu.concatenate %1, %2, %3, %4, %5, %6, %7, %8 in 2 : vector<8x16x3xf32>, vector<8x16x3xf32>, vector<8x16x3xf32>, vector<8x16x3xf32>, vector<8x16x3xf32>, vector<8x16x3xf32>, vector<8x16x3xf32>, vector<8x16x3xf32> -> vector<8x16x24xf32>
    %10 = vector.shape_cast %9 : vector<8x16x24xf32> to vector<128x24xf32>
    %c0_2 = arith.constant 0 : index
    %c0_3 = arith.constant 0 : index
    %11 = vector.load %arg2[%c0_2, %c0_3] : memref<24x64xf32, #tpu.memory_space<vmem>>, vector<24x64xf32>
    %cst = arith.constant dense<0.000000e+00> : vector<128x64xf32>
    %12 = tpu.matmul %10, %11, %cst {dimension_numbers = #tpu.dot_dimension_numbers<[1], [0], [0], [1], [0, 0, 1, 1], [], []>} : vector<128x24xf32>, vector<24x64xf32>, vector<128x64xf32> -> vector<128x64xf32>
    %c0_4 = arith.constant 0 : index
    %c0_5 = arith.constant 0 : index
    %13 = vector.load %arg3[%c0_4, %c0_5] : memref<1x64xf32, #tpu.memory_space<vmem>>, vector<1x64xf32>
    %14 = vector.broadcast %13 : vector<1x64xf32> to vector<128x64xf32>
    %15 = arith.addf %12, %14 : vector<128x64xf32>
    %cst_6 = arith.constant 0.000000e+00 : f32
    %16 = vector.broadcast %cst_6 : f32 to vector<128x64xf32>
    %17 = arith.maximumf %15, %16 : vector<128x64xf32>
    %18 = vector.shape_cast %17 : vector<128x64xf32> to vector<8x16x64xf32>
    %cst_7 = arith.constant 0.000000e+00 : f32
    %19 = vector.broadcast %cst_7 : f32 to vector<8x2x64xf32>
    %cst_8 = arith.constant 0.000000e+00 : f32
    %20 = vector.broadcast %cst_8 : f32 to vector<8x2x64xf32>
    %21 = tpu.concatenate %19, %18, %20 in 1 : vector<8x2x64xf32>, vector<8x16x64xf32>, vector<8x2x64xf32> -> vector<8x20x64xf32>
    %22 = vector.extract_strided_slice %21 {offsets = [0, 0, 0], sizes = [8, 16, 64], strides = [1, 1, 1]} : vector<8x20x64xf32> to vector<8x16x64xf32>
    %23 = vector.extract_strided_slice %21 {offsets = [0, 1, 0], sizes = [8, 16, 64], strides = [1, 1, 1]} : vector<8x20x64xf32> to vector<8x16x64xf32>
    %24 = vector.extract_strided_slice %21 {offsets = [0, 2, 0], sizes = [8, 16, 64], strides = [1, 1, 1]} : vector<8x20x64xf32> to vector<8x16x64xf32>
    %25 = vector.extract_strided_slice %21 {offsets = [0, 3, 0], sizes = [8, 16, 64], strides = [1, 1, 1]} : vector<8x20x64xf32> to vector<8x16x64xf32>
    %26 = vector.extract_strided_slice %21 {offsets = [0, 4, 0], sizes = [8, 16, 64], strides = [1, 1, 1]} : vector<8x20x64xf32> to vector<8x16x64xf32>
    %27 = tpu.concatenate %22, %23, %24, %25, %26 in 2 : vector<8x16x64xf32>, vector<8x16x64xf32>, vector<8x16x64xf32>, vector<8x16x64xf32>, vector<8x16x64xf32> -> vector<8x16x320xf32>
    %28 = vector.shape_cast %27 : vector<8x16x320xf32> to vector<128x320xf32>
    %c0_9 = arith.constant 0 : index
    %c0_10 = arith.constant 0 : index
    %29 = vector.load %arg4[%c0_9, %c0_10] : memref<320x128xf32, #tpu.memory_space<vmem>>, vector<320x128xf32>
    %cst_11 = arith.constant dense<0.000000e+00> : vector<128x128xf32>
    %30 = tpu.matmul %28, %29, %cst_11 {dimension_numbers = #tpu.dot_dimension_numbers<[1], [0], [0], [1], [0, 0, 1, 1], [], []>} : vector<128x320xf32>, vector<320x128xf32>, vector<128x128xf32> -> vector<128x128xf32>
    %c0_12 = arith.constant 0 : index
    %c0_13 = arith.constant 0 : index
    %31 = vector.load %arg5[%c0_12, %c0_13] : memref<1x128xf32, #tpu.memory_space<vmem>>, vector<1x128xf32>
    %32 = vector.broadcast %31 : vector<1x128xf32> to vector<128x128xf32>
    %33 = arith.addf %30, %32 : vector<128x128xf32>
    %cst_14 = arith.constant 0.000000e+00 : f32
    %34 = vector.broadcast %cst_14 : f32 to vector<128x128xf32>
    %35 = arith.maximumf %33, %34 : vector<128x128xf32>
    %36 = vector.shape_cast %35 : vector<128x128xf32> to vector<8x16x128xf32>
    %cst_15 = arith.constant dense<0.000000e+00> : vector<8x128xf32>
    %37 = vector.multi_reduction <add>, %36, %cst_15 [1] : vector<8x16x128xf32> to vector<8x128xf32>
    %cst_16 = arith.constant 1.600000e+01 : f32
    %38 = vector.broadcast %cst_16 : f32 to vector<8x128xf32>
    %39 = arith.divf %37, %38 : vector<8x128xf32>
    %c0_17 = arith.constant 0 : index
    %c0_18 = arith.constant 0 : index
    %40 = vector.load %arg6[%c0_17, %c0_18] : memref<8x128xf32, #tpu.memory_space<vmem>>, vector<8x128xf32>
    tpu.vector_store %arg6[%c0_17, %c0_18], %39 {strides = array<i32>} : memref<8x128xf32, #tpu.memory_space<vmem>>, vector<8x128xf32>,
    return
  }
  func.func @transform_0(%arg0: i32) -> (i32, i32, i32) {
    %c0_i32 = arith.constant 0 : i32
    %c0_i32_0 = arith.constant 0 : i32
    %c0_i32_1 = arith.constant 0 : i32
    return %arg0, %c0_i32, %c0_i32_0 : i32, i32, i32
  }
  func.func @transform_1(%arg0: i32) -> (i32, i32) {
    %c0_i32 = arith.constant 0 : i32
    %c0_i32_0 = arith.constant 0 : i32
    %c0_i32_1 = arith.constant 0 : i32
    return %c0_i32, %c0_i32_0 : i32, i32
  }
  func.func @transform_2(%arg0: i32) -> (i32, i32) {
    %c0_i32 = arith.constant 0 : i32
    %c0_i32_0 = arith.constant 0 : i32
    %c0_i32_1 = arith.constant 0 : i32
    return %c0_i32, %c0_i32_0 : i32, i32
  }
  func.func @transform_3(%arg0: i32) -> (i32, i32) {
    %c0_i32 = arith.constant 0 : i32
    %c0_i32_0 = arith.constant 0 : i32
    %c0_i32_1 = arith.constant 0 : i32
    return %c0_i32, %c0_i32_0 : i32, i32
  }
  func.func @transform_4(%arg0: i32) -> (i32, i32) {
    %c0_i32 = arith.constant 0 : i32
    %c0_i32_0 = arith.constant 0 : i32
    %c0_i32_1 = arith.constant 0 : i32
    return %c0_i32, %c0_i32_0 : i32, i32
  }
  func.func @transform_5(%arg0: i32) -> (i32, i32) {
    %c0_i32 = arith.constant 0 : i32
    %c0_i32_0 = arith.constant 0 : i32
    return %arg0, %c0_i32 : i32, i32
  }
}

</mosaic_0001>

<bundles_post_ra>
// kernel: tpu_custom_call.1
= control target key start
LH: loop header
LB: loop body
LE: loop exit
PB: predicated region body
PF: predicated region fallthrough
CT: control target
= control target key end

     0   :  { %10 = vsyncpa [#allocation3], 0  ;;  %s3528_s0 = inlined_call_operand.vmem [shape: f32[16,23,3], index: 0, kind: input, shape index: {}]   ;;  %s3529_s1 = inlined_call_operand.vmem [shape: f32[24,64], index: 1, kind: input, shape index: {}]   ;;  %s3530_s2 = inlined_call_operand.vmem [shape: f32[1,64], index: 2, kind: input, shape index: {}]   ;;  %s3531_s3 = inlined_call_operand.vmem [shape: f32[320,128], index: 3, kind: input, shape index: {}]   ;;  %s3532_s4 = inlined_call_operand.vmem [shape: f32[1,128], index: 4, kind: input, shape index: {}]   ;;  %s3533_s5 = inlined_call_operand.hbm [shape: f32[16,128], index: 5, kind: output, shape index: {}]  }
   0x1   :  { %12 = vsyncpa [#allocation3 + $0x1], 0  ;;  %s2239_s18 = smov 0   ;;  %s2241_s19 = smov 0  }
   0x2   :  { %s2243_s20 = smov 0   ;;  %s2245_s21 = smov 0  }
   0x3 LB: > { %s2012_s22 = sadd.s32 4294967295, %s2198_s21   ;;  %s2013_s23 = sadd.s32 4294967294, %s2198_s21   ;;  %s2198_s21 = sphi %s2245_s21, %s3539_s21   ;;  %s2194_s20 = sphi %s2243_s20, %s3538_s20   ;;  %s2190_s19 = sphi %s2241_s19, %s3537_s19   ;;  %s2186_s18 = sphi %s2239_s18, %s3536_s18  }
   0x4   : > { %s2262_s24 = sadd.s32 1, %s2198_s21   ;;  %s135_s25 = sadd.s32 1, %s2194_s20 }
   0x5   : > { %s132_s26 = ssub.s32 %s2198_s21, %s2262_s24  ;;  %p145_p0 = scmp.ne.s32.totalorder %s2194_s20, %s2190_s19 }
   0x6   : > { %p133_p1 = scmp.eq.s32.totalorder %s132_s26, 0  ;;  %p146_p2 = scmp.eq.s32.totalorder %s2012_s22, 1 }
   0x7   : > { %p151_p3 = scmp.ne.s32.totalorder %s2190_s19, %s2186_s18  ;;  %p152_p4 = scmp.eq.s32.totalorder %s2013_s23, 1 }
   0x8   : > { %s2272_s27 = scalar_select %p133_p1, %s2194_s20, %s135_s25  }
   0x9   : > { %p2274_p5 = por %p146_p2, %p145_p0  ;;  %p2278_p6 = por %p152_p4, %p151_p3 }
   0xa   : > { %p2016_p7 = scmp.ge.s32.totalorder %s2198_s21, 1  ;;  %p192_p8 = scmp.lt.s32.totalorder %s2198_s21, 3 }
   0xc   : > { %p193_p9 = pnand %p2016_p7, %p192_p8 }
   0xd   : > { %s2284_s30 = sshll.u32 (!%p193_p9), %s2012_s22, 3  ;;  %s2200_s11 = smov (!%p193_p9), 15  }
   0xe   : > { %196 = sbr.rel (%p193_p9) target bundleno = 864 (0x360), region = 40  ;;  %p222_p10 = scmp.lt.s32.totalorder (!%p193_p9), %s2284_s30, 15 }
   0xf   : > { %s2201_s12 = smov (!%p193_p9), 9   ;;  %s2202_s13 = smov (!%p193_p9), 3  }
  0x10   : > { %s2203_s14 = smov (!%p193_p9), 18   ;;  %s2204_s15 = smov (!%p193_p9), 12  }
  0x11   : > { %s2205_s16 = smov (!%p193_p9), 6   ;;  %s2206_s17 = smov (!%p193_p9), 21  }
  0x13   : > { %s223_s6 = scalar_select %p222_p10, %s2284_s30, 15  ;;  %vm632_vm0 = vcmask 1042432   ;;  %vm454_vm1 = vcmask 1044480   ;;  %vm276_vm2 = vcmask 1046528   ;;  %vm721_vm3 = vcmask 1041408  }
  0x14   : > { %vm543_vm4 = vcmask 1043456   ;;  %vm365_vm5 = vcmask 1045504   ;;  %vm810_vm6 = vcmask 1040384   ;;  %vm899_vm7 = vcmask 23552  }
  0x15   : > { %s2072_s7 = smul.u32 24, %s223_s6  ;;  %vm916_vm8 = vcmask 48128   ;;  %vm933_vm9 = vcmask 72704   ;;  %vm950_vm10 = vcmask 97280   ;;  %vm967_vm11 = vcmask 121856   ;;  %s1949_s6 = scalar_lea.hbm %s3533_s5, %s2284_s30 }
  0x16   : > { %vm984_vm12 = vcmask 146432   ;;  %vm1001_vm13 = vcmask 171008   ;;  %vm1025_vm14 = vcmask 195584   ;;  %vm1523_vm15 = vcmask 523264   ;;  %s1953_s9 = sshll.u32 %s1949_s6, 4  ;;  %s1954_s9 = int_to_ptr.hbm [resolvable:$true] %s1953_s9 }
  0x17   : > { %s2291_s10 = scalar_lea.vmem %s3528_s0, %s2072_s7 }
  0x18   : > { %v2294_v0 = vld [vmem:[%s2291_s10] sm:$0xff]  ;;  %v2297_v1 = vld [vmem:[%s2291_s10 + $0x8] sm:$0xff]  ;;  %v230_v20 = vld [vmem:[%s2291_s10 + $0x10] sm:$0x7f] }
  0x19   : > { %v633_v2 = vrot.slane %v2294_v0, 5  ;;  %v634_v3 = vrot.slane %v2297_v1, 5  ;;  %v455_v4 = vrot.slane %v2294_v0, 3  ;;  %v456_v5 = vrot.slane %v2297_v1, 3  ;;  %v2336_v34 = vld [vmem:[%s2291_s10 + $0x18] sm:$0xff]  ;;  %v2339_v35 = vld [vmem:[%s2291_s10 + $0x20] sm:$0xff] }
  0x1a   : > { %v277_v6 = vrot.slane %v2294_v0, 1  ;;  %v278_v7 = vrot.slane %v2297_v1, 1  ;;  %v722_v11 = vrot.slane %v2294_v0, 6  ;;  %v723_v12 = vrot.slane %v2297_v1, 6  ;;  %v233_v61 = vld [vmem:[%s2291_s10 + $0x28] sm:$0x7f] }
  0x1b   : > { %v635_v8 = vsel %vm632_vm0, %v633_v2, %v634_v3  ;;  %v457_v9 = vsel %vm454_vm1, %v455_v4, %v456_v5  ;;  %v544_v13 = vrot.slane %v2294_v0, 4  ;;  %v545_v14 = vrot.slane %v2297_v1, 4 }
  0x1c   : > { %673 = vrot.lane.b32.xlu2 %v635_v8, %s2200_s11  ;;  %495 = vrot.lane.b32.xlu1 %v457_v9, %s2201_s12  ;;  %v279_v10 = vsel %vm276_vm2, %v277_v6, %v278_v7  ;;  %v366_v15 = vrot.slane %v2294_v0, 2  ;;  %v367_v16 = vrot.slane %v2297_v1, 2  ;;  %v724_v17 = vsel %vm721_vm3, %v722_v11, %v723_v12 }
  0x1d   : > { %317 = vrot.lane.b32.xlu0 %v279_v10, %s2202_s13  ;;  %v546_v18 = vsel %vm543_vm4, %v544_v13, %v545_v14  ;;  %v369_v21 = vrot.slane %v230_v20, 2  ;;  %v280_v22 = vrot.slane %v230_v20, 1  ;;  %v811_v23 = vrot.slane %v2294_v0, 7  ;;  %v2390_v13 = vld [vmem:[%s2291_s10 + $0x38] sm:$0xff] }
  0x1e   : > { %v368_v19 = vsel %vm365_vm5, %v366_v15, %v367_v16  ;;  %v812_v24 = vrot.slane %v2297_v1, 7  ;;  %v636_v28 = vrot.slane %v230_v20, 5  ;;  %v547_v29 = vrot.slane %v230_v20, 4 }
  0x1f   : > { %v370_v25 = vsel %vm365_vm5, %v367_v16, %v369_v21  ;;  %v281_v26 = vsel %vm276_vm2, %v278_v7, %v280_v22  ;;  %v458_v30 = vrot.slane %v230_v20, 3  ;;  %v282_v36 = vrot.slane %v2336_v34, 1 }
  0x20   : > { %v813_v27 = vsel %vm810_vm6, %v811_v23, %v812_v24  ;;  %v637_v31 = vsel %vm632_vm0, %v634_v3, %v636_v28  ;;  %v548_v32 = vsel %vm543_vm4, %v545_v14, %v547_v29  ;;  %v283_v37 = vrot.slane %v2339_v35, 1 }
  0x21   : > { %v459_v33 = vsel %vm454_vm1, %v456_v5, %v458_v30  ;;  %v814_v38 = vrot.slane %v230_v20, 7  ;;  %v725_v39 = vrot.slane %v230_v20, 6  ;;  %v549_v43 = vrot.slane %v2336_v34, 4 }
  0x22   : > { %v284_v40 = vsel %vm276_vm2, %v282_v36, %v283_v37  ;;  %v550_v44 = vrot.slane %v2339_v35, 4  ;;  %v460_v45 = vrot.slane %v2336_v34, 3  ;;  %v461_v46 = vrot.slane %v2339_v35, 3 }
  0x23   : > { %v815_v41 = vsel %vm810_vm6, %v812_v24, %v814_v38  ;;  %v726_v42 = vsel %vm721_vm3, %v723_v12, %v725_v39  ;;  %v371_v47 = vrot.slane %v2336_v34, 2  ;;  %v372_v48 = vrot.slane %v2339_v35, 2  ;;  %v2387_v12 = vld [vmem:[%s2291_s10 + $0x30] sm:$0xff] }
  0x24   : > { %762 = vrot.lane.b32.xlu2 %v724_v17, %s2203_s14  ;;  %584 = vrot.lane.b32.xlu1 %v546_v18, %s2204_s15  ;;  %v551_v49 = vsel %vm543_vm4, %v549_v43, %v550_v44  ;;  %v462_v50 = vsel %vm454_vm1, %v460_v45, %v461_v46  ;;  %v816_v52 = vrot.slane %v2336_v34, 7  ;;  %v817_v53 = vrot.slane %v2339_v35, 7 }
  0x25   : > { %406 = vrot.lane.b32.xlu0 %v368_v19, %s2205_s16  ;;  %v373_v51 = vsel %vm365_vm5, %v371_v47, %v372_v48  ;;  %v727_v54 = vrot.slane %v2336_v34, 6  ;;  %v728_v55 = vrot.slane %v2339_v35, 6  ;;  %v638_v56 = vrot.slane %v2336_v34, 5 }
  0x26   : > { %v639_v57 = vrot.slane %v2339_v35, 5  ;;  %v818_v58 = vsel %vm810_vm6, %v816_v52, %v817_v53  ;;  %v463_v62 = vrot.slane %v233_v61, 3  ;;  %v374_v63 = vrot.slane %v233_v61, 2  ;;  %v1019_v52 = vld [vmem:[%s3529_s1 + $0x8] sm:$0xff] }
  0x27   : > { %v729_v59 = vsel %vm721_vm3, %v727_v54, %v728_v55  ;;  %v285_v2 = vrot.slane %v233_v61, 1  ;;  %v730_v6 = vrot.slane %v233_v61, 6  ;;  %v641_v7 = vrot.slane %v233_v61, 5 }
  0x28   : > { %v640_v60 = vsel %vm632_vm0, %v638_v56, %v639_v57  ;;  %v464_v3 = vsel %vm454_vm1, %v461_v46, %v463_v62  ;;  %v375_v4 = vsel %vm365_vm5, %v372_v48, %v374_v63  ;;  %v552_v8 = vrot.slane %v233_v61, 4 }
  0x29   : > { %v286_v5 = vsel %vm276_vm2, %v283_v37, %v285_v2  ;;  %v731_v9 = vsel %vm721_vm3, %v728_v55, %v730_v6  ;;  %v642_v10 = vsel %vm632_vm0, %v639_v57, %v641_v7  ;;  %v376_v14 = vrot.slane %v2387_v12, 2  ;;  %v1018_v55 = vld [vmem:[%s3529_s1] sm:$0xff] }
  0x2a   : > { %v553_v11 = vsel %vm543_vm4, %v550_v44, %v552_v8  ;;  %v377_v15 = vrot.slane %v2390_v13, 2  ;;  %v287_v16 = vrot.slane %v2387_v12, 1  ;;  %v288_v17 = vrot.slane %v2390_v13, 1 }
  0x2b   : > { %v819_v18 = vrot.slane %v233_v61, 7  ;;  %v643_v22 = vrot.slane %v2387_v12, 5  ;;  %v644_v23 = vrot.slane %v2390_v13, 5  ;;  %v554_v24 = vrot.slane %v2387_v12, 4 }
  0x2c   : > { %408 = vrot.lane.b32.xlu2 %v370_v25, %s2205_s16  ;;  %319 = vrot.lane.b32.xlu1 %v281_v26, %s2202_s13  ;;  %v378_v19 = vsel %vm365_vm5, %v376_v14, %v377_v15  ;;  %v289_v20 = vsel %vm276_vm2, %v287_v16, %v288_v17  ;;  %v555_v25 = vrot.slane %v2390_v13, 4  ;;  %v465_v26 = vrot.slane %v2387_v12, 3 }
  0x2d   : > { %851 = vrot.lane.b32.xlu0 %v813_v27, %s2206_s17  ;;  %v820_v21 = vsel %vm810_vm6, %v817_v53, %v819_v18  ;;  %v466_v27 = vrot.slane %v2390_v13, 3  ;;  %v645_v28 = vsel %vm632_vm0, %v643_v22, %v644_v23  ;;  %v822_v36 = vrot.slane %v2390_v13, 7 }
  0x2e   : > { %v556_v29 = vsel %vm543_vm4, %v554_v24, %v555_v25  ;;  %v732_v37 = vrot.slane %v2387_v12, 6  ;;  %v733_v38 = vrot.slane %v2390_v13, 6 }
  0x2f   : > { %v467_v30 = vsel %vm454_vm1, %v465_v26, %v466_v27 }
  0x34   : > { %675 = vrot.lane.b32.xlu2 %v637_v31, %s2200_s11  ;;  %586 = vrot.lane.b32.xlu1 %v548_v32, %s2204_s15  ;;  %v236_v31 = vld [vmem:[%s2291_s10 + $0x40] sm:$0x7f] }
  0x35   : > { %497 = vrot.lane.b32.xlu0 %v459_v33, %s2201_s12  ;;  %v290_v32 = vrot.slane %v236_v31, 1  ;;  %v821_v33 = vrot.slane %v2387_v12, 7  ;;  %v468_v43 = vrot.slane %v236_v31, 3  ;;  %v379_v45 = vrot.slane %v236_v31, 2 }
  0x36   : > { %v646_v54 = vrot.slane %v236_v31, 5 }
  0x37   : > { %v291_v39 = vsel %vm276_vm2, %v288_v17, %v290_v32  ;;  %v469_v47 = vsel %vm454_vm1, %v466_v27, %v468_v43  ;;  %v380_v48 = vsel %vm365_vm5, %v377_v15, %v379_v45 }
  0x3c   : > { %321 = vrot.lane.b32.xlu2 %v284_v40, %s2202_s13  ;;  %853 = vrot.lane.b32.xlu1 %v815_v41, %s2206_s17  ;;  %v823_v40 = vsel %vm810_vm6, %v821_v33, %v822_v36  ;;  %v734_v41 = vsel %vm721_vm3, %v732_v37, %v733_v38 }
  0x3d   : > { %764 = vrot.lane.b32.xlu0 %v726_v42, %s2203_s14  ;;  %v557_v42 = vrot.slane %v236_v31, 4 }
  0x3f   : > { %v558_v46 = vsel %vm543_vm4, %v555_v25, %v557_v42 }
  0x44   : > { %588 = vrot.lane.b32.xlu2 %v551_v49, %s2204_s15  ;;  %499 = vrot.lane.b32.xlu1 %v462_v50, %s2201_s12  ;;  %v1020_v49 = vld [vmem:[%s3529_s1 + $0x10] sm:$0xff]  ;;  %v824_v50 = vrot.slane %v236_v31, 7 }
  0x45   : > { %410 = vrot.lane.b32.xlu0 %v373_v51, %s2205_s16  ;;  %1087 = vmatpush.msra.mxu0 %v1020_v49  ;;  %v735_v51 = vrot.slane %v236_v31, 6 }
  0x46   : > { %v825_v56 = vsel %vm810_vm6, %v822_v36, %v824_v50 }
  0x47   : > { %1088 = vmatpush.msra.mxu0 %v1019_v52  ;;  %v736_v57 = vsel %vm721_vm3, %v733_v38, %v735_v51  ;;  %v2521_v51 = vld [vmem:[%s2291_s10 + $0x60] sm:$0xff]  ;;  %v2524_v52 = vld [vmem:[%s2291_s10 + $0x68] sm:$0xff] }
  0x49   : > { %1089 = vmatpush.msra.mxu0 %v1018_v55  ;;  %v298_v55 = vrot.slane %v2524_v52, 1 }
  0x4c   : > { %855 = vrot.lane.b32.xlu2 %v818_v58, %s2206_s17  ;;  %766 = vrot.lane.b32.xlu1 %v729_v59, %s2203_s14  ;;  %v647_v58 = vsel %vm632_vm0, %v644_v23, %v646_v54  ;;  %v2451_v59 = vld [vmem:[%s2291_s10 + $0x48] sm:$0xff]  ;;  %v239_v23 = vld [vmem:[%s2291_s10 + $0x58] sm:$0x7f] }
  0x4d   : > { %677 = vrot.lane.b32.xlu0 %v640_v60, %s2200_s11  ;;  %v2454_v60 = vld [vmem:[%s2291_s10 + $0x50] sm:$0xff]  ;;  %v470_v61 = vrot.slane %v2451_v59, 3  ;;  %v381_v63 = vrot.slane %v2451_v59, 2  ;;  %v559_v17 = vrot.slane %v2451_v59, 4  ;;  %v384_v24 = vrot.slane %v239_v23, 2 }
  0x4e   : > { %v471_v62 = vrot.slane %v2454_v60, 3  ;;  %v382_v2 = vrot.slane %v2454_v60, 2  ;;  %v649_v14 = vrot.slane %v2454_v60, 5  ;;  %v560_v18 = vrot.slane %v2454_v60, 4 }
  0x4f   : > { %v295_v25 = vrot.slane %v239_v23, 1  ;;  %v473_v45 = vrot.slane %v239_v23, 3 }
  0x50   : > { %v472_v6 = vsel %vm454_vm1, %v470_v61, %v471_v62  ;;  %v383_v7 = vsel %vm365_vm5, %v381_v63, %v382_v2  ;;  %v561_v22 = vsel %vm543_vm4, %v559_v17, %v560_v18  ;;  %v385_v36 = vsel %vm365_vm5, %v382_v2, %v384_v24 }
  0x51   : > { %v474_v50 = vsel %vm454_vm1, %v471_v62, %v473_v45  ;;  %v740_v62 = vrot.slane %v239_v23, 6  ;;  %v832_v24 = vrot.slane %v2524_v52, 7 }
  0x54   : > { %501 = vrot.lane.b32.xlu2 %v464_v3, %s2201_s12  ;;  %412 = vrot.lane.b32.xlu1 %v375_v4, %s2205_s16  ;;  %v292_v4 = vrot.slane %v2451_v59, 1 }
  0x55   : > { %323 = vrot.lane.b32.xlu0 %v286_v5, %s2202_s13  ;;  %v293_v5 = vrot.slane %v2454_v60, 1 }
  0x57   : > { %v294_v8 = vsel %vm276_vm2, %v292_v4, %v293_v5  ;;  %v296_v37 = vsel %vm276_vm2, %v293_v5, %v295_v25  ;;  %v742_v25 = vrot.slane %v2521_v51, 6 }
  0x5c   : > { %768 = vrot.lane.b32.xlu2 %v731_v9, %s2203_s14  ;;  %679 = vrot.lane.b32.xlu1 %v642_v10, %s2200_s11  ;;  %v737_v9 = vrot.slane %v2451_v59, 6  ;;  %v738_v10 = vrot.slane %v2454_v60, 6 }
  0x5d   : > { %590 = vrot.lane.b32.xlu0 %v553_v11, %s2204_s15  ;;  %v648_v11 = vrot.slane %v2451_v59, 5 }
  0x5e   : > { %v741_v5 = vsel %vm721_vm3, %v738_v10, %v740_v62 }
  0x64   : > { %414 = vrot.lane.b32.xlu2 %v378_v19, %s2205_s16  ;;  %325 = vrot.lane.b32.xlu1 %v289_v20, %s2202_s13  ;;  %v739_v20 = vsel %vm721_vm3, %v737_v9, %v738_v10  ;;  %v476_v9 = vrot.slane %v2524_v52, 3  ;;  %v386_v10 = vrot.slane %v2521_v51, 2 }
  0x65   : > { %857 = vrot.lane.b32.xlu0 %v820_v21, %s2206_s17  ;;  %v650_v21 = vsel %vm632_vm0, %v648_v11, %v649_v14 }
  0x6c   : > { %681 = vrot.lane.b32.xlu2 %v645_v28, %s2200_s11  ;;  %592 = vrot.lane.b32.xlu1 %v556_v29, %s2204_s15  ;;  %v826_v28 = vrot.slane %v2451_v59, 7  ;;  %v827_v29 = vrot.slane %v2454_v60, 7 }
  0x6d   : > { %503 = vrot.lane.b32.xlu0 %v467_v30, %s2201_s12 }
  0x74   : > { %327 = vrot.lane.b32.xlu2 %v291_v39, %s2202_s13  ;;  %859 = vrot.lane.b32.xlu1 %v823_v40, %s2206_s17  ;;  %v828_v39 = vsel %vm810_vm6, %v826_v28, %v827_v29  ;;  %v651_v40 = vrot.slane %v239_v23, 5 }
  0x75   : > { %770 = vrot.lane.b32.xlu0 %v734_v41, %s2203_s14  ;;  %v562_v41 = vrot.slane %v239_v23, 4 }
  0x76   : > { %v2428_v44 = vpop.permute.xlu2 %673 }
  0x77   : > { %v563_v49 = vsel %vm543_vm4, %v560_v18, %v562_v41 }
  0x7c   : > { %594 = vrot.lane.b32.xlu2 %v558_v46, %s2204_s15  ;;  %505 = vrot.lane.b32.xlu1 %v469_v47, %s2201_s12 }
  0x7d   : > { %416 = vrot.lane.b32.xlu0 %v380_v48, %s2205_s16 }
  0x7e   : > { %v2442_v53 = vpop.permute.xlu2 %762 }
  0x84   : > { %861 = vrot.lane.b32.xlu2 %v825_v56, %s2206_s17  ;;  %772 = vrot.lane.b32.xlu1 %v736_v57, %s2203_s14  ;;  %v829_v56 = vrot.slane %v239_v23, 7 }
  0x85   : > { %683 = vrot.lane.b32.xlu0 %v647_v58, %s2200_s11 }
  0x86   : > { %v2463_v3 = vpop.permute.xlu2 %408  ;;  %v830_v4 = vsel %vm810_vm6, %v827_v29, %v829_v56 }
  0x8c   : > { %507 = vrot.lane.b32.xlu2 %v472_v6, %s2201_s12  ;;  %418 = vrot.lane.b32.xlu1 %v383_v7, %s2205_s16  ;;  %v565_v7 = vrot.slane %v2524_v52, 4 }
  0x8d   : > { %329 = vrot.lane.b32.xlu0 %v294_v8, %s2202_s13  ;;  %v475_v8 = vrot.slane %v2521_v51, 3 }
  0x8e   : > { %v2479_v15 = vpop.permute.xlu2 %675  ;;  %v496_v16 = vpop.permute.xlu1 %495 }
  0x8f   : > { %v318_v19 = vpop.permute.xlu0 %317 }
  0x90   : > { %v900_v30 = vsel %vm899_vm7, %v2294_v0, %v318_v19 }
  0x94   : > { %774 = vrot.lane.b32.xlu2 %v739_v20, %s2203_s14  ;;  %685 = vrot.lane.b32.xlu1 %v650_v21, %s2200_s11 }
  0x95   : > { %596 = vrot.lane.b32.xlu0 %v561_v22, %s2204_s15  ;;  %v477_v22 = vsel %vm454_vm1, %v475_v8, %v476_v9 }
  0x96   : > { %v2492_v26 = vpop.permute.xlu2 %321  ;;  %v585_v27 = vpop.permute.xlu1 %584 }
  0x97   : > { %v407_v31 = vpop.permute.xlu0 %406  ;;  %v902_v28 = vsel %vm899_vm7, %v2336_v34, %v2492_v26 }
  0x98   : > { %v917_v32 = vsel %vm916_vm8, %v900_v30, %v407_v31  ;;  %v653_v31 = vrot.slane %v2521_v51, 5 }
  0x99   : > { %v934_v33 = vsel %vm933_vm9, %v917_v32, %v496_v16  ;;  %v387_v16 = vrot.slane %v2524_v52, 2  ;;  %v654_v32 = vrot.slane %v2524_v52, 5 }
  0x9a   : > { %v951_v38 = vsel %vm950_vm10, %v934_v33, %v585_v27  ;;  %v743_v27 = vrot.slane %v2524_v52, 6 }
  0x9b   : > { %v968_v0 = vsel %vm967_vm11, %v951_v38, %v2428_v44  ;;  %v652_v44 = vsel %vm632_vm0, %v649_v14, %v651_v40  ;;  %v388_v23 = vsel %vm365_vm5, %v386_v10, %v387_v16 }
  0x9c   : > { %420 = vrot.lane.b32.xlu2 %v385_v36, %s2205_s16  ;;  %331 = vrot.lane.b32.xlu1 %v296_v37, %s2202_s13  ;;  %v985_v47 = vsel %vm984_vm12, %v968_v0, %v2442_v53  ;;  %v297_v53 = vrot.slane %v2521_v51, 1  ;;  %v744_v38 = vsel %vm721_vm3, %v742_v25, %v743_v27  ;;  %v242_v0 = vld [vmem:[%s2291_s10 + $0x70] sm:$0x7f] }
  0x9d   : > { %863 = vrot.lane.b32.xlu0 %v828_v39, %s2206_s17  ;;  %v655_v39 = vsel %vm632_vm0, %v653_v31, %v654_v32  ;;  %v478_v26 = vrot.slane %v242_v0, 3  ;;  %v389_v40 = vrot.slane %v242_v0, 2  ;;  %v300_v45 = vrot.slane %v242_v0, 1 }
  0x9e   : > { %v2509_v42 = vpop.permute.xlu2 %588  ;;  %v320_v43 = vpop.permute.xlu1 %319  ;;  %v299_v2 = vsel %vm276_vm2, %v297_v53, %v298_v55  ;;  %v656_v56 = vrot.slane %v242_v0, 5  ;;  %v567_v62 = vrot.slane %v242_v0, 4  ;;  %v834_v10 = vrot.slane %v242_v0, 7 }
  0x9f   : > { %v852_v46 = vpop.permute.xlu0 %851  ;;  %v901_v54 = vsel %vm899_vm7, %v2297_v1, %v320_v43  ;;  %v301_v53 = vsel %vm276_vm2, %v298_v55, %v300_v45 }
  0xa0   : > { %v1002_v48 = vsel %vm1001_vm13, %v985_v47, %v852_v46  ;;  %v918_v61 = vsel %vm916_vm8, %v901_v54, %v2463_v3  ;;  %v564_v3 = vrot.slane %v2521_v51, 4  ;;  %v657_v55 = vsel %vm632_vm0, %v654_v32, %v656_v56 }
  0xa1   : > { %2020 = vmatmul.msk.f32.vlgmr.msra.gmra.mxu0 %vm1025_vm14, %v1002_v48 }
  0xa2   : > { %v566_v21 = vsel %vm543_vm4, %v564_v3, %v565_v7 }
  0xa4   : > { %687 = vrot.lane.b32.xlu2 %v652_v44, %s2200_s11  ;;  %598 = vrot.lane.b32.xlu1 %v563_v49, %s2204_s15  ;;  %v479_v49 = vsel %vm454_vm1, %v476_v9, %v478_v26 }
  0xa5   : > { %509 = vrot.lane.b32.xlu0 %v474_v50, %s2201_s12  ;;  %v390_v50 = vsel %vm365_vm5, %v387_v16, %v389_v40 }
  0xa6   : > { %v2533_v57 = vpop.permute.xlu2 %855  ;;  %v587_v58 = vpop.permute.xlu1 %586 }
  0xa7   : > { %v498_v63 = vpop.permute.xlu0 %497 }
  0xa8   : > { %v935_v1 = vsel %vm933_vm9, %v918_v61, %v498_v63 }
  0xa9   : > { %v952_v6 = vsel %vm950_vm10, %v935_v1, %v587_v58  ;;  %v2614_v1 = vld [vmem:[%s2291_s10 + $0x78] sm:$0xff] }
  0xaa   : > { %v969_v17 = vsel %vm967_vm11, %v952_v6, %v2479_v15  ;;  %v831_v15 = vrot.slane %v2521_v51, 7  ;;  %v391_v6 = vrot.slane %v2614_v1, 2 }
  0xac   : > { %333 = vrot.lane.b32.xlu2 %v299_v2, %s2202_s13  ;;  %865 = vrot.lane.b32.xlu1 %v830_v4, %s2206_s17  ;;  %v833_v37 = vsel %vm810_vm6, %v831_v15, %v832_v24  ;;  %v568_v4 = vsel %vm543_vm4, %v565_v7, %v567_v62  ;;  %v569_v15 = vrot.slane %v2614_v1, 4 }
  0xad   : > { %776 = vrot.lane.b32.xlu0 %v741_v5, %s2203_s14  ;;  %v2622_v5 = vld [vmem:[%s2291_s10 + $0x80] sm:$0xff] }
  0xae   : > { %v2553_v11 = vpop.permute.xlu2 %501  ;;  %v854_v14 = vpop.permute.xlu1 %853  ;;  %v392_v8 = vrot.slane %v2622_v5, 2  ;;  %v303_v9 = vrot.slane %v2622_v5, 1  ;;  %v570_v25 = vrot.slane %v2622_v5, 4  ;;  %v837_v26 = vrot.slane %v2622_v5, 7 }
  0xaf   : > { %v765_v18 = vpop.permute.xlu0 %764 }
  0xb0   : > { %v986_v19 = vsel %vm984_vm12, %v969_v17, %v765_v18 }
  0xb1   : > { %v1003_v20 = vsel %vm1001_vm13, %v986_v19, %v854_v14  ;;  %v393_v19 = vsel %vm365_vm5, %v391_v6, %v392_v8 }
  0xb2   : > { %2021 = vmatmul.msk.f32.gmra.mxu0 %vm1025_vm14, %v1003_v20 }
  0xb4   : > { %600 = vrot.lane.b32.xlu2 %v566_v21, %s2204_s15  ;;  %511 = vrot.lane.b32.xlu1 %v477_v22, %s2201_s12  ;;  %v835_v21 = vsel %vm810_vm6, %v832_v24, %v834_v10 }
  0xb5   : > { %422 = vrot.lane.b32.xlu0 %v388_v23, %s2205_s16  ;;  %v659_v23 = vrot.slane %v2622_v5, 5 }
  0xb6   : > { %v2577_v29 = vpop.permute.xlu2 %768  ;;  %v500_v30 = vpop.permute.xlu1 %499 }
  0xb7   : > { %v411_v33 = vpop.permute.xlu0 %410 }
  0xb8   : > { %v919_v36 = vsel %vm916_vm8, %v902_v28, %v411_v33  ;;  %v480_v28 = vrot.slane %v2614_v1, 3 }
  0xb9   : > { %v936_v34 = vsel %vm933_vm9, %v919_v36, %v500_v30  ;;  %v481_v30 = vrot.slane %v2622_v5, 3 }
  0xba   : > { %v953_v46 = vsel %vm950_vm10, %v936_v34, %v2509_v42  ;;  %v745_v42 = vrot.slane %v242_v0, 6  ;;  %v836_v34 = vrot.slane %v2614_v1, 7 }
  0xbc   : > { %867 = vrot.lane.b32.xlu2 %v833_v37, %s2206_s17  ;;  %778 = vrot.lane.b32.xlu1 %v744_v38, %s2203_s14  ;;  %v746_v63 = vsel %vm721_vm3, %v743_v27, %v745_v42  ;;  %v571_v37 = vsel %vm543_vm4, %v569_v15, %v570_v25  ;;  %v482_v38 = vsel %vm454_vm1, %v480_v28, %v481_v30 }
  0xbd   : > { %689 = vrot.lane.b32.xlu0 %v655_v39, %s2200_s11  ;;  %v245_v39 = vld [vmem:[%s2291_s10 + $0x88] sm:$0x7f] }
  0xbe   : > { %v2592_v41 = vpop.permute.xlu2 %414  ;;  %v767_v43 = vpop.permute.xlu1 %766  ;;  %v661_v10 = vrot.slane %v245_v39, 5 }
  0xbf   : > { %v678_v47 = vpop.permute.xlu0 %677 }
  0xc0   : > { %v970_v48 = vsel %vm967_vm11, %v953_v46, %v678_v47  ;;  %v747_v46 = vrot.slane %v2614_v1, 6 }
  0xc1   : > { %v987_v44 = vsel %vm984_vm12, %v970_v48, %v767_v43 }
  0xc2   : > { %v1004_v54 = vsel %vm1001_vm13, %v987_v44, %v2533_v57 }
  0xc3   : > { %2022 = vmatmul.msk.f32.gmra.mxu0 %vm1025_vm14, %v1004_v54 }
  0xc4   : > { %513 = vrot.lane.b32.xlu2 %v479_v49, %s2201_s12  ;;  %424 = vrot.lane.b32.xlu1 %v390_v50, %s2205_s16  ;;  %v838_v49 = vsel %vm810_vm6, %v836_v34, %v837_v26 }
  0xc5   : > { %335 = vrot.lane.b32.xlu0 %v301_v53, %s2202_s13  ;;  %v483_v53 = vrot.slane %v245_v39, 3 }
  0xc6   : > { %v2609_v58 = vpop.permute.xlu2 %681  ;;  %v413_v61 = vpop.permute.xlu1 %412 }
  0xc7   : > { %v324_v57 = vpop.permute.xlu0 %323 }
  0xc8   : > { %v903_v2 = vsel %vm899_vm7, %v2339_v35, %v324_v57  ;;  %v302_v35 = vrot.slane %v2614_v1, 1 }
  0xc9   : > { %v920_v3 = vsel %vm916_vm8, %v903_v2, %v413_v61  ;;  %v394_v61 = vrot.slane %v245_v39, 2 }
  0xca   : > { %v937_v17 = vsel %vm933_vm9, %v920_v3, %v2553_v11  ;;  %v304_v20 = vsel %vm276_vm2, %v302_v35, %v303_v9  ;;  %v658_v11 = vrot.slane %v2614_v1, 5  ;;  %v750_v3 = vrot.slane %v245_v39, 6 }
  0xcb   : > { %v395_v6 = vsel %vm365_vm5, %v392_v8, %v394_v61 }
  0xcc   : > { %780 = vrot.lane.b32.xlu2 %v746_v63, %s2203_s14  ;;  %691 = vrot.lane.b32.xlu1 %v657_v55, %s2200_s11  ;;  %v660_v36 = vsel %vm632_vm0, %v658_v11, %v659_v23 }
  0xcd   : > { %602 = vrot.lane.b32.xlu0 %v568_v4, %s2204_s15  ;;  %v484_v4 = vsel %vm454_vm1, %v481_v30, %v483_v53 }
  0xce   : > { %v2632_v14 = vpop.permute.xlu2 %327  ;;  %v680_v7 = vpop.permute.xlu1 %679 }
  0xcf   : > { %v591_v16 = vpop.permute.xlu0 %590  ;;  %v905_v35 = vsel %vm899_vm7, %v2390_v13, %v2632_v14 }
  0xd0   : > { %v954_v18 = vsel %vm950_vm10, %v937_v17, %v591_v16 }
  0xd1   : > { %v971_v22 = vsel %vm967_vm11, %v954_v18, %v680_v7 }
  0xd2   : > { %v988_v32 = vsel %vm984_vm12, %v971_v22, %v2577_v29  ;;  %v305_v29 = vrot.slane %v245_v39, 1 }
  0xd4   : > { %426 = vrot.lane.b32.xlu2 %v393_v19, %s2205_s16  ;;  %337 = vrot.lane.b32.xlu1 %v304_v20, %s2202_s13  ;;  %v306_v44 = vsel %vm276_vm2, %v303_v9, %v305_v29  ;;  %v662_v19 = vsel %vm632_vm0, %v659_v23, %v661_v10  ;;  %v2712_v20 = vld [vmem:[%s2291_s10 + $0x90] sm:$0xff] }
  0xd5   : > { %869 = vrot.lane.b32.xlu0 %v835_v21, %s2206_s17  ;;  %v2715_v21 = vld [vmem:[%s2291_s10 + $0x98] sm:$0xff]  ;;  %v485_v14 = vrot.slane %v2712_v20, 3  ;;  %v396_v11 = vrot.slane %v2712_v20, 2  ;;  %v663_v29 = vrot.slane %v2712_v20, 5 }
  0xd6   : > { %v2652_v27 = vpop.permute.xlu2 %594  ;;  %v326_v24 = vpop.permute.xlu1 %325  ;;  %v486_v22 = vrot.slane %v2715_v21, 3  ;;  %v397_v23 = vrot.slane %v2715_v21, 2  ;;  %v308_v28 = vrot.slane %v2715_v21, 1  ;;  %v664_v34 = vrot.slane %v2715_v21, 5 }
  0xd7   : > { %v858_v31 = vpop.permute.xlu0 %857  ;;  %v904_v0 = vsel %vm899_vm7, %v2387_v12, %v326_v24  ;;  %v748_v12 = vrot.slane %v2622_v5, 6  ;;  %v307_v24 = vrot.slane %v2712_v20, 1  ;;  %v842_v61 = vrot.slane %v2715_v21, 7 }
  0xd8   : > { %v1005_v33 = vsel %vm1001_vm13, %v988_v32, %v858_v31  ;;  %v921_v45 = vsel %vm916_vm8, %v904_v0, %v2592_v41  ;;  %v572_v41 = vrot.slane %v245_v39, 4  ;;  %v753_v0 = vrot.slane %v2715_v21, 6 }
  0xd9   : > { %2023 = vmatmul.msk.f32.gmra.mxu0 %vm1025_vm14, %v1005_v33  ;;  %v749_v50 = vsel %vm721_vm3, %v747_v46, %v748_v12  ;;  %v751_v18 = vsel %vm721_vm3, %v748_v12, %v750_v3 }
  0xda   : > { %v573_v2 = vsel %vm543_vm4, %v570_v25, %v572_v41 }
  0xdc   : > { %693 = vrot.lane.b32.xlu2 %v660_v36, %s2200_s11  ;;  %604 = vrot.lane.b32.xlu1 %v571_v37, %s2204_s15  ;;  %v487_v36 = vsel %vm454_vm1, %v485_v14, %v486_v22  ;;  %v398_v37 = vsel %vm365_vm5, %v396_v11, %v397_v23  ;;  %v1592_v11 = vld [vmem:[%s3531_s3 + $0x120] sm:$0xff] }
  0xdd   : > { %515 = vrot.lane.b32.xlu0 %v482_v38, %s2201_s12 }
  0xde   : > { %v862_v40 = vpop.permute.xlu2 %861  ;;  %v593_v43 = vpop.permute.xlu1 %592 }
  0xdf   : > { %v504_v47 = vpop.permute.xlu0 %503 }
  0xe0   : > { %v938_v48 = vsel %vm933_vm9, %v921_v45, %v504_v47  ;;  %v575_v45 = vrot.slane %v2715_v21, 4  ;;  %v665_v47 = vsel %vm632_vm0, %v663_v29, %v664_v34 }
  0xe1   : > { %v955_v54 = vsel %vm950_vm10, %v938_v48, %v593_v43  ;;  %v574_v43 = vrot.slane %v2712_v20, 4 }
  0xe2   : > { %v972_v62 = vsel %vm967_vm11, %v955_v54, %v2609_v58  ;;  %v839_v58 = vrot.slane %v245_v39, 7  ;;  %v309_v39 = vsel %vm276_vm2, %v307_v24, %v308_v28 }
  0xe4   : > { %339 = vrot.lane.b32.xlu2 %v306_v44, %s2202_s13  ;;  %871 = vrot.lane.b32.xlu1 %v838_v49, %s2206_s17  ;;  %v840_v17 = vsel %vm810_vm6, %v837_v26, %v839_v58  ;;  %v576_v44 = vsel %vm543_vm4, %v574_v43, %v575_v45  ;;  %v2759_v49 = vld [vmem:[%s2291_s10 + $0xa0] sm:$0x7f]  ;;  %v1594_v58 = vld [vmem:[%s3531_s3 + $0x130] sm:$0xff] }
  0xe5   : > { %782 = vrot.lane.b32.xlu0 %v749_v50, %s2203_s14  ;;  %v399_v54 = vrot.slane %v2759_v49, 2  ;;  %v310_v41 = vrot.slane %v2759_v49, 1 }
  0xe6   : > { %v2685_v42 = vpop.permute.xlu2 %507  ;;  %v860_v56 = vpop.permute.xlu1 %859 }
  0xe7   : > { %v771_v57 = vpop.permute.xlu0 %770 }
  0xe8   : > { %v989_v63 = vsel %vm984_vm12, %v972_v62, %v771_v57 }
  0xe9   : > { %v1006_v55 = vsel %vm1001_vm13, %v989_v63, %v860_v56 }
  0xea   : > { %2024 = vmatmul.msk.f32.gmra.mxu0 %vm1025_vm14, %v1006_v55  ;;  %v400_v55 = vsel %vm365_vm5, %v397_v23, %v399_v54 }
  0xec   : > { %606 = vrot.lane.b32.xlu2 %v573_v2, %s2204_s15  ;;  %517 = vrot.lane.b32.xlu1 %v484_v4, %s2201_s12  ;;  %v311_v2 = vsel %vm276_vm2, %v308_v28, %v310_v41  ;;  %v1595_v4 = vld [vmem:[%s3531_s3 + $0x138] sm:$0xff] }
  0xed   : > { %428 = vrot.lane.b32.xlu0 %v395_v6, %s2205_s16  ;;  %1770 = vmatpush.msra.mxu3 %v1595_v4  ;;  %v1591_v28 = vld [vmem:[%s3531_s3 + $0x118] sm:$0xff] }
  0xee   : > { %v2703_v9 = vpop.permute.xlu2 %774  ;;  %v506_v7 = vpop.permute.xlu1 %505 }
  0xef   : > { %v417_v16 = vpop.permute.xlu0 %416  ;;  %1771 = vmatpush.msra.mxu3 %v1594_v58 }
  0xf0   : > { %v922_v8 = vsel %vm916_vm8, %v905_v35, %v417_v16  ;;  %v577_v35 = vrot.slane %v2759_v49, 4 }
  0xf1   : > { %v939_v13 = vsel %vm933_vm9, %v922_v8, %v506_v7  ;;  %v1593_v7 = vld [vmem:[%s3531_s3 + $0x128] sm:$0xff]  ;;  %v488_v8 = vrot.slane %v2759_v49, 3 }
  0xf2   : > { %v956_v30 = vsel %vm950_vm10, %v939_v13, %v2652_v27  ;;  %v752_v27 = vrot.slane %v2712_v20, 6  ;;  %1772 = vmatpush.msra.mxu3 %v1593_v7  ;;  %v578_v14 = vsel %vm543_vm4, %v575_v45, %v577_v35 }
  0xf3   : > { %v489_v23 = vsel %vm454_vm1, %v486_v22, %v488_v8 }
  0xf4   : > { %873 = vrot.lane.b32.xlu2 %v840_v17, %s2206_s17  ;;  %784 = vrot.lane.b32.xlu1 %v751_v18, %s2203_s14  ;;  %v754_v12 = vsel %vm721_vm3, %v752_v27, %v753_v0 }
  0xf5   : > { %695 = vrot.lane.b32.xlu0 %v662_v19, %s2200_s11  ;;  %1773 = vmatpush.msra.mxu3 %v1592_v11 }
  0xf6   : > { %v2725_v15 = vpop.permute.xlu2 %420  ;;  %v773_v25 = vpop.permute.xlu1 %772 }
  0xf7   : > { %v684_v31 = vpop.permute.xlu0 %683  ;;  %1774 = vmatpush.msra.mxu3 %v1591_v28 }
  0xf8   : > { %v973_v32 = vsel %vm967_vm11, %v956_v30, %v684_v31  ;;  %v844_v31 = vrot.slane %v2759_v49, 7 }
  0xf9   : > { %v990_v33 = vsel %vm984_vm12, %v973_v32, %v773_v25  ;;  %v2808_v25 = vld [vmem:[%s2291_s10 + $0xa8] sm:$0xff] }
  0xfa   : > { %v1007_v38 = vsel %vm1001_vm13, %v990_v33, %v862_v40  ;;  %v312_v22 = vrot.slane %v2808_v25, 1  ;;  %v579_v45 = vrot.slane %v2808_v25, 4  ;;  %v668_v58 = vrot.slane %v2808_v25, 5 }
  0xfb   : > { %2025 = vmatmul.msk.f32.gmra.mxu0 %vm1025_vm14, %v1007_v38  ;;  %v1589_v38 = vld [vmem:[%s3531_s3 + $0x108] sm:$0xff] }
  0xfc   : > { %519 = vrot.lane.b32.xlu2 %v487_v36, %s2201_s12  ;;  %430 = vrot.lane.b32.xlu1 %v398_v37, %s2205_s16  ;;  %v755_v37 = vrot.slane %v2759_v49, 6 }
  0xfd   : > { %341 = vrot.lane.b32.xlu0 %v309_v39, %s2202_s13 }
  0xfe   : > { %v2747_v26 = vpop.permute.xlu2 %687  ;;  %v419_v40 = vpop.permute.xlu1 %418 }
  0xff   : > { %v330_v46 = vpop.permute.xlu0 %329 }
 0x100   : > { %v906_v48 = vsel %vm899_vm7, %v2451_v59, %v330_v46  ;;  %v841_v59 = vrot.slane %v2712_v20, 7 }
 0x101   : > { %v923_v50 = vsel %vm916_vm8, %v906_v48, %v419_v40  ;;  %v756_v40 = vsel %vm721_vm3, %v753_v0, %v755_v37  ;;  %v401_v0 = vrot.slane %v2808_v25, 2 }
 0x102   : > { %v940_v57 = vsel %vm933_vm9, %v923_v50, %v2685_v42  ;;  %v843_v6 = vsel %vm810_vm6, %v841_v59, %v842_v61  ;;  %v666_v42 = vrot.slane %v2759_v49, 5 }
 0x104   : > { %786 = vrot.lane.b32.xlu2 %v754_v12, %s2203_s14  ;;  %697 = vrot.lane.b32.xlu1 %v665_v47, %s2200_s11  ;;  %v667_v13 = vsel %vm632_vm0, %v664_v34, %v666_v42  ;;  %v845_v34 = vsel %vm810_vm6, %v842_v61, %v844_v31  ;;  %v490_v12 = vrot.slane %v2808_v25, 3 }
 0x105   : > { %608 = vrot.lane.b32.xlu0 %v576_v44, %s2204_s15 }
 0x106   : > { %v2767_v53 = vpop.permute.xlu2 %333  ;;  %v686_v56 = vpop.permute.xlu1 %685 }
 0x107   : > { %v597_v62 = vpop.permute.xlu0 %596  ;;  %v908_v42 = vsel %vm899_vm7, %v2521_v51, %v2767_v53 }
 0x108   : > { %v957_v63 = vsel %vm950_vm10, %v940_v57, %v597_v62  ;;  %v2871_v57 = vld [vmem:[%s3530_s2] ss:$0 sm:$0xff] }
 0x109   : > { %v974_v3 = vsel %vm967_vm11, %v957_v63, %v686_v56  ;;  %v846_v63 = vrot.slane %v2808_v25, 7 }
 0x10a   : > { %v991_v18 = vsel %vm984_vm12, %v974_v3, %v2703_v9  ;;  %v2811_v9 = vld [vmem:[%s2291_s10 + $0xb0] sm:$0xff] }
 0x10b   : > { %v313_v30 = vrot.slane %v2811_v9, 1  ;;  %v580_v46 = vrot.slane %v2811_v9, 4  ;;  %v491_v47 = vrot.slane %v2811_v9, 3  ;;  %v402_v44 = vrot.slane %v2811_v9, 2 }
 0x10c   : > { %432 = vrot.lane.b32.xlu2 %v400_v55, %s2205_s16  ;;  %343 = vrot.lane.b32.xlu1 %v311_v2, %s2202_s13  ;;  %v847_v55 = vrot.slane %v2811_v9, 7  ;;  %v757_v2 = vrot.slane %v2808_v25, 6  ;;  %v758_v4 = vrot.slane %v2811_v9, 6  ;;  %v669_v3 = vrot.slane %v2811_v9, 5 }
 0x10d   : > { %875 = vrot.lane.b32.xlu0 %v843_v6, %s2206_s17  ;;  %v314_v29 = vsel %vm276_vm2, %v312_v22, %v313_v30  ;;  %v581_v59 = vsel %vm543_vm4, %v579_v45, %v580_v46  ;;  %v492_v61 = vsel %vm454_vm1, %v490_v12, %v491_v47  ;;  %v403_v62 = vsel %vm365_vm5, %v401_v0, %v402_v44 }
 0x10e   : > { %v2792_v10 = vpop.permute.xlu2 %600  ;;  %v332_v16 = vpop.permute.xlu1 %331  ;;  %v848_v8 = vsel %vm810_vm6, %v846_v63, %v847_v55 }
 0x10f   : > { %v864_v17 = vpop.permute.xlu0 %863  ;;  %v907_v24 = vsel %vm899_vm7, %v2454_v60, %v332_v16  ;;  %v1590_v60 = vld [vmem:[%s3531_s3 + $0x110] sm:$0xff] }
 0x110   : > { %v1008_v19 = vsel %vm1001_vm13, %v991_v18, %v864_v17  ;;  %v924_v36 = vsel %vm916_vm8, %v907_v24, %v2725_v15  ;;  %1775 = vmatpush.msra.mxu3 %v1590_v60  ;;  %v1588_v15 = vld [vmem:[%s3531_s3 + $0x100] sm:$0xff]  ;;  %v759_v17 = vsel %vm721_vm3, %v757_v2, %v758_v4 }
 0x111   : > { %2026 = vmatmul.msk.f32.gmra.mxu0 %vm1025_vm14, %v1008_v19  ;;  %v670_v19 = vsel %vm632_vm0, %v668_v58, %v669_v3 }
 0x112   : > { %1776 = vmatpush.msra.mxu3 %v1589_v38 }
 0x114   : > { %699 = vrot.lane.b32.xlu2 %v667_v13, %s2200_s11  ;;  %610 = vrot.lane.b32.xlu1 %v578_v14, %s2204_s15  ;;  %v251_v13 = vld [vmem:[%s2291_s10 + $0xb8] sm:$0x7f]  ;;  %s2207_s10 = smov 64  }
 0x115   : > { %521 = vrot.lane.b32.xlu0 %v489_v23, %s2201_s12  ;;  %1777 = vmatpush.msra.mxu3 %v1588_v15  ;;  %v493_v53 = vrot.slane %v251_v13, 3  ;;  %v404_v11 = vrot.slane %v251_v13, 2  ;;  %v315_v23 = vrot.slane %v251_v13, 1  ;;  %v582_v12 = vrot.slane %v251_v13, 4 }
 0x116   : > { %v2827_v32 = vpop.permute.xlu2 %867  ;;  %v599_v33 = vpop.permute.xlu1 %598  ;;  %v849_v63 = vrot.slane %v251_v13, 7 }
 0x117   : > { %v510_v39 = vpop.permute.xlu0 %509  ;;  %v494_v38 = vsel %vm454_vm1, %v491_v47, %v493_v53 }
 0x118   : > { %v941_v27 = vsel %vm933_vm9, %v924_v36, %v510_v39 }
 0x119   : > { %v958_v43 = vsel %vm950_vm10, %v941_v27, %v599_v33 }
 0x11a   : > { %v975_v50 = vsel %vm967_vm11, %v958_v43, %v2747_v26  ;;  %v760_v43 = vrot.slane %v251_v13, 6 }
 0x11c   : > { %345 = vrot.lane.b32.xlu2 %v314_v29, %s2202_s13  ;;  %877 = vrot.lane.b32.xlu1 %v845_v34, %s2206_s17  ;;  %v405_v29 = vsel %vm365_vm5, %v402_v44, %v404_v11  ;;  %v316_v34 = vsel %vm276_vm2, %v313_v30, %v315_v23  ;;  %v671_v30 = vrot.slane %v251_v13, 5 }
 0x11d   : > { %788 = vrot.lane.b32.xlu0 %v756_v40, %s2203_s14 }
 0x11e   : > { %v2854_v48 = vpop.permute.xlu2 %513  ;;  %v866_v49 = vpop.permute.xlu1 %865 }
 0x11f   : > { %v777_v54 = vpop.permute.xlu0 %776  ;;  %v1091_v26 = vpop.f32.mrf.mxu0 }
 0x120   : > { %v992_v41 = vsel %vm984_vm12, %v975_v50, %v777_v54  ;;  %v1092_v16 = vadd.f32 %v2871_v57, %v1091_v26  ;;  %v761_v50 = vsel %vm721_vm3, %v758_v4, %v760_v43 }
 0x121   : > { %v1009_v56 = vsel %vm1001_vm13, %v992_v41, %v866_v49 }
 0x122   : > { %2027 = vmatmul.msk.f32.gmra.mxu0 %vm1025_vm14, %v1009_v56  ;;  %v1139_v14 = vmax.f32 %v1092_v16, 0.0  ;;  %v672_v56 = vsel %vm632_vm0, %v669_v3, %v671_v30 }
 0x124   : > { %612 = vrot.lane.b32.xlu2 %v581_v59, %s2204_s15  ;;  %523 = vrot.lane.b32.xlu1 %v492_v61, %s2201_s12  ;;  %v1171_v22 = vrot.slane %v1139_v14, 6  ;;  %v583_v59 = vsel %vm543_vm4, %v580_v46, %v582_v12 }
 0x125   : > { %434 = vrot.lane.b32.xlu0 %v403_v62, %s2205_s16 }
 0x126   : > { %v2880_v6 = vpop.permute.xlu2 %780  ;;  %v512_v35 = vpop.permute.xlu1 %511  ;;  %v2914_v40 = vsel %vm721_vm3, 0.0, %v1171_v22 }
 0x127   : > { %v423_v7 = vpop.permute.xlu0 %422 }
 0x128   : > { %v925_v18 = vsel %vm916_vm8, %v908_v42, %v423_v7  ;;  %v1395_v7 = vrot.slane %v2914_v40, 3 }
 0x129   : > { %v942_v51 = vsel %vm933_vm9, %v925_v18, %v512_v35  ;;  %v850_v35 = vsel %vm810_vm6, %v847_v55, %v849_v63  ;;  %vm1932_vm6 = vcmask 1046534  }
 0x12a   : > { %v959_v33 = vsel %vm950_vm10, %v942_v51, %v2792_v10 }
 0x12c   : > { %879 = vrot.lane.b32.xlu2 %v848_v8, %s2206_s17  ;;  %790 = vrot.lane.b32.xlu1 %v759_v17, %s2203_s14 }
 0x12d   : > { %701 = vrot.lane.b32.xlu0 %v670_v19, %s2200_s11 }
 0x12e   : > { %v779_v24 = vpop.permute.xlu1 %778  ;;  %v2899_v31 = vpop.permute.xlu2 %426 }
 0x12f   : > { %v1094_v28 = vpop.f32.mrf.mxu0  ;;  %v690_v36 = vpop.permute.xlu0 %689 }
 0x130   : > { %v1095_v60 = vadd.f32 %v2871_v57, %v1094_v28  ;;  %v976_v37 = vsel %vm967_vm11, %v959_v33, %v690_v36 }
 0x131   : > { %v993_v27 = vsel %vm984_vm12, %v976_v37, %v779_v24 }
 0x132   : > { %v1140_v39 = vmax.f32 %v1095_v60, 0.0  ;;  %v1010_v15 = vsel %vm1001_vm13, %v993_v27, %v2827_v32  ;;  %v1483_v32 = vrot.slane %v2914_v40, 4 }
 0x133   : > { %2028 = vmatmul.msk.f32.gmra.mxu0 %vm1025_vm14, %v1010_v15 }
 0x134   : > { %v1172_v10 = vrot.slane %v1140_v39, 6  ;;  %525 = vrot.lane.b32.xlu2 %v494_v38, %s2201_s12  ;;  %436 = vrot.lane.b32.xlu1 %v405_v29, %s2205_s16 }
 0x135   : > { %347 = vrot.lane.b32.xlu0 %v316_v34, %s2202_s13 }
 0x136   : > { %v2921_v45 = vsel %vm721_vm3, %v1171_v22, %v1172_v10  ;;  %v425_v47 = vpop.permute.xlu1 %424  ;;  %v2928_v54 = vsel %vm721_vm3, %v1172_v10, 0.0  ;;  %v694_v41 = vpop.permute.xlu2 %693 }
 0x137   : > { %v1484_v0 = vrot.slane %v2921_v45, 4  ;;  %v336_v44 = vpop.permute.xlu0 %335  ;;  %v1486_v62 = vrot.slane %v2928_v54, 4  ;;  %v1396_v4 = vrot.slane %v2921_v45, 3  ;;  %v1398_v58 = vrot.slane %v2928_v54, 3 }
 0x138   : > { %v909_v61 = vsel %vm899_vm7, %v2524_v52, %v336_v44  ;;  %v1252_v13 = vrot.slane %v2921_v45, 1  ;;  %v1254_v14 = vrot.slane %v2928_v54, 1 }
 0x139   : > { %v1485_v49 = vsel %vm543_vm4, %v1483_v32, %v1484_v0  ;;  %v926_v26 = vsel %vm916_vm8, %v909_v61, %v425_v47  ;;  %v1487_v3 = vsel %vm543_vm4, %v1484_v0, %v1486_v62  ;;  %v1399_v16 = vsel %vm454_vm1, %v1396_v4, %v1398_v58 }
 0x13a   : > { %2036 = vmatmul.msk.f32.vlgmr.msra.gmra.mxu3 %vm1523_vm15, %v1485_v49  ;;  %v943_v52 = vsel %vm933_vm9, %v926_v26, %v2854_v48  ;;  %v1397_v48 = vsel %vm454_vm1, %v1395_v7, %v1396_v4  ;;  %v1255_v23 = vsel %vm276_vm2, %v1252_v13, %v1254_v14 }
 0x13c   : > { %792 = vrot.lane.b32.xlu2 %v761_v50, %s2203_s14  ;;  %703 = vrot.lane.b32.xlu1 %v672_v56, %s2200_s11  ;;  %s2150_s11 = sshra.s32 %s1954_s9, 4  ;;  %s2151_s11 = int_to_ptr.hbm [resolvable:$true] %s2150_s11 }
 0x13d   : > { %614 = vrot.lane.b32.xlu0 %v583_v59, %s2204_s15  ;;  %s2152_s12 = scalar_lea.hbm %s2151_s11, 8  ;;  %s2156_s15 = scalar_lea.hbm %s3533_s5, 16 }
 0x13e   : > { %v692_v2 = vpop.permute.xlu1 %691  ;;  %v340_v8 = vpop.permute.xlu2 %339  ;;  %p2153_p11 = scmp.ne.s32.totalorder %s2151_s11, %s2152_s12  ;;  %p2157_p0 = scmp.lt.s32.totalorder %s2151_s11, %s3533_s5 }
 0x13f   : > { %v603_v46 = vpop.permute.xlu0 %602  ;;  %v911_v61 = vsel %vm899_vm7, %v2622_v5, %v340_v8  ;;  %p2158_p1 = scmp.lt.s32.totalorder %s2156_s15, %s2152_s12 }
 0x140   : > { %v960_v42 = vsel %vm950_vm10, %v943_v52, %v603_v46  ;;  %v1097_v53 = vpop.f32.mrf.mxu0  ;;  %p2154_p12 = pnand %p2153_p11, %p2274_p5 }
 0x141   : > { %v977_v17 = vsel %vm967_vm11, %v960_v42, %v692_v2  ;;  %v1098_v24 = vadd.f32 %v2871_v57, %v1097_v53  ;;  %p2159_p2 = por %p2158_p1, %p2157_p0 }
 0x142   : > { %2037 = vmatmul.msk.f32.gmra.mxu3 %vm1523_vm15, %v1487_v3  ;;  %v994_v55 = vsel %vm984_vm12, %v977_v17, %v2880_v6  ;;  %p2155_p13 = pneg %p2154_p12 }
 0x143   : > { %v1141_v33 = vmax.f32 %v1098_v24, 0.0 }
 0x144   : > { %1437 = vrot.lane.b32.xlu2 %v1399_v16, %s2207_s10  ;;  %1435 = vrot.lane.b32.xlu1 %v1397_v48, %s2207_s10  ;;  %p2160_p3 = pnand %p2159_p2, %p2155_p13 }
 0x145   : > { %881 = vrot.lane.b32.xlu0 %v850_v35, %s2206_s17  ;;  %v1174_v37 = vrot.slane %v1141_v33, 6 }
 0x146   : > { %v338_v18 = vpop.permute.xlu1 %337  ;;  %v607_v6 = vpop.permute.xlu2 %606 }
 0x147   : > { %v870_v19 = vpop.permute.xlu0 %869  ;;  %v910_v11 = vsel %vm899_vm7, %v2614_v1, %v338_v18  ;;  %v2979_v10 = vsel %vm721_vm3, 0.0, %v1174_v37 }
 0x148   : > { %v1011_v51 = vsel %vm1001_vm13, %v994_v55, %v870_v19  ;;  %v927_v22 = vsel %vm916_vm8, %v910_v11, %v2899_v31  ;;  %v1488_v47 = vrot.slane %v2979_v10, 4  ;;  %v1400_v44 = vrot.slane %v2979_v10, 3 }
 0x149   : > { %2029 = vmatmul.msk.f32.gmra.mxu0 %vm1025_vm14, %v1011_v51  ;;  %v1256_v49 = vrot.slane %v2979_v10, 1 }
 0x14d   : > { %1293 = vrot.lane.b32.xlu0 %v1255_v23, %s2207_s10 }
 0x14e   : > { %v605_v28 = vpop.permute.xlu1 %604  ;;  %v874_v29 = vpop.permute.xlu2 %873 }
 0x14f   : > { %v516_v60 = vpop.permute.xlu0 %515 }
 0x150   : > { %v944_v36 = vsel %vm933_vm9, %v927_v22, %v516_v60 }
 0x151   : > { %v961_v1 = vsel %vm950_vm10, %v944_v36, %v605_v28 }
 0x152   : > { %v978_v34 = vsel %vm967_vm11, %v961_v1, %v694_v41 }
 0x156   : > { %v1100_v38 = vpop.f32.mrf.mxu0  ;;  %v872_v27 = vpop.permute.xlu1 %871 }
 0x157   : > { %v1101_v39 = vadd.f32 %v2871_v57, %v1100_v38  ;;  %v783_v15 = vpop.permute.xlu0 %782  ;;  %v520_v46 = vpop.permute.xlu2 %519 }
 0x158   : > { %v995_v31 = vsel %vm984_vm12, %v978_v34, %v783_v15  ;;  %v1585_v34 = vld [vmem:[%s3531_s3 + $0xe8] sm:$0xff] }
 0x159   : > { %v1142_v43 = vmax.f32 %v1101_v39, 0.0  ;;  %v1012_v30 = vsel %vm1001_vm13, %v995_v31, %v872_v27  ;;  %v1587_v39 = vld [vmem:[%s3531_s3 + $0xf8] sm:$0xff] }
 0x15a   : > { %2030 = vmatmul.msk.f32.gmra.mxu0 %vm1025_vm14, %v1012_v30  ;;  %1697 = vmatpush.msra.mxu2 %v1587_v39 }
 0x15b   : > { %v1175_v12 = vrot.slane %v1142_v43, 6 }
 0x15d   : > { %v2986_v32 = vsel %vm721_vm3, %v1174_v37, %v1175_v12  ;;  %v2989_v0 = vsel %vm721_vm3, %v1175_v12, 0.0 }
 0x15e   : > { %v1489_v50 = vrot.slane %v2986_v32, 4  ;;  %v1401_v41 = vrot.slane %v2986_v32, 3  ;;  %v1403_v56 = vrot.slane %v2989_v0, 3  ;;  %v1257_v59 = vrot.slane %v2986_v32, 1  ;;  %v518_v62 = vpop.permute.xlu1 %517 }
 0x15f   : > { %v429_v26 = vpop.permute.xlu0 %428  ;;  %v1491_v5 = vrot.slane %v2989_v0, 4  ;;  %v1259_v42 = vrot.slane %v2989_v0, 1  ;;  %v787_v55 = vpop.permute.xlu2 %786 }
 0x160   : > { %v1490_v63 = vsel %vm543_vm4, %v1488_v47, %v1489_v50  ;;  %v1404_v2 = vsel %vm454_vm1, %v1401_v41, %v1403_v56  ;;  %v1402_v4 = vsel %vm454_vm1, %v1400_v44, %v1401_v41  ;;  %v1258_v58 = vsel %vm276_vm2, %v1256_v49, %v1257_v59 }
 0x161   : > { %2038 = vmatmul.msk.f32.gmra.mxu3 %vm1523_vm15, %v1490_v63  ;;  %1441 = vrot.lane.b32.xlu0 %v1404_v2, %s2207_s10  ;;  %v928_v52 = vsel %vm916_vm8, %v911_v61, %v429_v26  ;;  %v1492_v8 = vsel %vm543_vm4, %v1489_v50, %v1491_v5  ;;  %v1260_v17 = vsel %vm276_vm2, %v1257_v59, %v1259_v42  ;;  %v1584_v2 = vld [vmem:[%s3531_s3 + $0xe0] sm:$0xff]  ;;  %v1571_v5 = vld [vmem:[%s3531_s3 + $0x78] sm:$0xff] }
 0x162   : > { %1439 = vrot.lane.b32.xlu1 %v1402_v4, %s2207_s10  ;;  %1295 = vrot.lane.b32.xlu2 %v1258_v58, %s2207_s10  ;;  %v945_v3 = vsel %vm933_vm9, %v928_v52, %v518_v62 }
 0x163   : > { %v962_v7 = vsel %vm950_vm10, %v945_v3, %v607_v6  ;;  %v1583_v3 = vld [vmem:[%s3531_s3 + $0xd8] sm:$0xff]  ;;  %2056 = vmatpush.msra.mxu1 %v1571_v5  ;;  %1632 = vmatpush.msrb.mxu0 %v1571_v5  ;;  %v1557_v5 = vld [vmem:[%s3531_s3 + $0x8] sm:$0xff] }
 0x166   : > { %v785_v35 = vpop.permute.xlu1 %784 }
 0x167   : > { %v696_v16 = vpop.permute.xlu0 %695  ;;  %v1103_v14 = vpop.f32.mrf.mxu0 }
 0x168   : > { %v979_v48 = vsel %vm967_vm11, %v962_v7, %v696_v16  ;;  %v1104_v53 = vadd.f32 %v2871_v57, %v1103_v14  ;;  %v433_v6 = vpop.permute.xlu2 %432  ;;  %v1582_v7 = vld [vmem:[%s3531_s3 + $0xd0] sm:$0xff]  ;;  %v1580_v14 = vld [vmem:[%s3531_s3 + $0xc0] sm:$0xff] }
 0x169   : > { %2039 = vmatmul.msk.f32.gmra.mxu3 %vm1523_vm15, %v1492_v8  ;;  %v996_v18 = vsel %vm984_vm12, %v979_v48, %v785_v35  ;;  %v1570_v35 = vld [vmem:[%s3531_s3 + $0x70] sm:$0xff]  ;;  %v1581_v8 = vld [vmem:[%s3531_s3 + $0xc8] sm:$0xff] }
 0x16a   : > { %1297 = vrot.lane.b32.xlu1 %v1260_v17, %s2207_s10  ;;  %v1013_v19 = vsel %vm1001_vm13, %v996_v18, %v874_v29  ;;  %v1143_v24 = vmax.f32 %v1104_v53, 0.0  ;;  %2057 = vmatpush.msra.mxu1 %v1570_v35 }
 0x16b   : > { %2031 = vmatmul.msk.f32.gmra.mxu0 %vm1025_vm14, %v1013_v19 }
 0x16c   : > { %v1177_v60 = vrot.slane %v1143_v24, 6  ;;  %1633 = vmatpush.msrb.mxu0 %v1570_v35 }
 0x16e   : > { %v431_v51 = vpop.permute.xlu1 %430  ;;  %v3034_v29 = vsel %vm721_vm3, 0.0, %v1177_v60 }
 0x16f   : > { %v342_v11 = vpop.permute.xlu0 %341  ;;  %v1493_v47 = vrot.slane %v3034_v29, 4  ;;  %v1405_v44 = vrot.slane %v3034_v29, 3  ;;  %v1261_v26 = vrot.slane %v3034_v29, 1 }
 0x170   : > { %v912_v23 = vsel %vm899_vm7, %v2712_v20, %v342_v11  ;;  %v1586_v20 = vld [vmem:[%s3531_s3 + $0xf0] sm:$0xff]  ;;  %v3048_v49 = vpop.permute.xlu2 %699 }
 0x171   : > { %v929_v28 = vsel %vm916_vm8, %v912_v23, %v431_v51  ;;  %1698 = vmatpush.msra.mxu2 %v1586_v20  ;;  %v1567_v23 = vld [vmem:[%s3531_s3 + $0x58] sm:$0xff]  ;;  %v1564_v20 = vld [vmem:[%s3531_s3 + $0x40] sm:$0xff] }
 0x172   : > { %v946_v37 = vsel %vm933_vm9, %v929_v28, %v520_v46  ;;  %v1566_v28 = vld [vmem:[%s3531_s3 + $0x50] sm:$0xff] }
 0x173   : > { %1699 = vmatpush.msra.mxu2 %v1585_v34 }
 0x175   : > { %1700 = vmatpush.msra.mxu2 %v1584_v2  ;;  %v1559_v2 = vld [vmem:[%s3531_s3 + $0x18] sm:$0xff] }
 0x176   : > { %v698_v22 = vpop.permute.xlu1 %697 }
 0x177   : > { %v609_v33 = vpop.permute.xlu0 %608  ;;  %1701 = vmatpush.msra.mxu2 %v1583_v3 }
 0x178   : > { %v1106_v36 = vpop.f32.mrf.mxu0  ;;  %v963_v38 = vsel %vm950_vm10, %v946_v37, %v609_v33  ;;  %v346_v51 = vpop.permute.xlu2 %345  ;;  %v1565_v33 = vld [vmem:[%s3531_s3 + $0x48] sm:$0xff] }
 0x179   : > { %v1107_v1 = vadd.f32 %v2871_v57, %v1106_v36  ;;  %v980_v15 = vsel %vm967_vm11, %v963_v38, %v698_v22  ;;  %1702 = vmatpush.msra.mxu2 %v1582_v7  ;;  %v1577_v37 = vld [vmem:[%s3531_s3 + $0xa8] sm:$0xff] }
 0x17a   : > { %v997_v41 = vsel %vm984_vm12, %v980_v15, %v787_v55  ;;  %v1568_v55 = vld [vmem:[%s3531_s3 + $0x60] sm:$0xff]  ;;  %v1563_v15 = vld [vmem:[%s3531_s3 + $0x38] sm:$0xff] }
 0x17b   : > { %v1144_v27 = vmax.f32 %v1107_v1, 0.0  ;;  %1703 = vmatpush.msra.mxu2 %v1581_v8  ;;  %v1556_v8 = vld [vmem:[%s3531_s3] sm:$0xff] }
 0x17d   : > { %v1178_v43 = vrot.slane %v1144_v27, 6  ;;  %1704 = vmatpush.msra.mxu2 %v1580_v14  ;;  %v1576_v27 = vld [vmem:[%s3531_s3 + $0xa0] sm:$0xff] }
 0x17e   : > { %v344_v12 = vpop.permute.xlu1 %343 }
 0x17f   : > { %v3041_v31 = vsel %vm721_vm3, %v1177_v60, %v1178_v43  ;;  %v3044_v30 = vsel %vm721_vm3, %v1178_v43, 0.0  ;;  %v876_v50 = vpop.permute.xlu0 %875  ;;  %v913_v42 = vsel %vm899_vm7, %v2715_v21, %v344_v12  ;;  %v1569_v21 = vld [vmem:[%s3531_s3 + $0x68] sm:$0xff]  ;;  %v1578_v60 = vld [vmem:[%s3531_s3 + $0xb0] sm:$0xff]  ;;  %v1575_v43 = vld [vmem:[%s3531_s3 + $0x98] sm:$0xff] }
 0x180   : > { %v1494_v56 = vrot.slane %v3041_v31, 4  ;;  %v1406_v59 = vrot.slane %v3041_v31, 3  ;;  %v1408_v61 = vrot.slane %v3044_v30, 3  ;;  %v1014_v62 = vsel %vm1001_vm13, %v997_v41, %v876_v50  ;;  %2058 = vmatpush.msra.mxu1 %v1569_v21  ;;  %1634 = vmatpush.msrb.mxu0 %v1569_v21  ;;  %v613_v12 = vpop.permute.xlu2 %612 }
 0x181   : > { %v1262_v63 = vrot.slane %v3041_v31, 1  ;;  %2032 = vmatmul.msk.f32.gmra.mxu0 %vm1025_vm14, %v1014_v62  ;;  %v1496_v16 = vrot.slane %v3044_v30, 4  ;;  %v930_v17 = vsel %vm916_vm8, %v913_v42, %v433_v6  ;;  %v1264_v18 = vrot.slane %v3044_v30, 1  ;;  %v1579_v6 = vld [vmem:[%s3531_s3 + $0xb8] sm:$0xff] }
 0x182   : > { %v1495_v4 = vsel %vm543_vm4, %v1493_v47, %v1494_v56  ;;  %v1409_v58 = vsel %vm454_vm1, %v1406_v59, %v1408_v61  ;;  %v1407_v46 = vsel %vm454_vm1, %v1405_v44, %v1406_v59  ;;  %2059 = vmatpush.msra.mxu1 %v1568_v55  ;;  %1635 = vmatpush.msrb.mxu0 %v1568_v55  ;;  %v1562_v44 = vld [vmem:[%s3531_s3 + $0x30] sm:$0xff]  ;;  %v1561_v59 = vld [vmem:[%s3531_s3 + $0x28] sm:$0xff] }
 0x183   : > { %2040 = vmatmul.msk.f32.gmra.mxu3 %vm1523_vm15, %v1495_v4  ;;  %1445 = vrot.lane.b32.xlu1 %v1409_v58, %s2207_s10  ;;  %v1263_v52 = vsel %vm276_vm2, %v1261_v26, %v1262_v63  ;;  %v1497_v11 = vsel %vm543_vm4, %v1494_v56, %v1496_v16  ;;  %v1265_v24 = vsel %vm276_vm2, %v1262_v63, %v1264_v18  ;;  %v1573_v61 = vld [vmem:[%s3531_s3 + $0x88] sm:$0xff]  ;;  %v1560_v26 = vld [vmem:[%s3531_s3 + $0x20] sm:$0xff]  ;;  %v1558_v58 = vld [vmem:[%s3531_s3 + $0x10] sm:$0xff] }
 0x184   : > { %1443 = vrot.lane.b32.xlu2 %v1407_v46, %s2207_s10  ;;  %1299 = vrot.lane.b32.xlu0 %v1263_v52, %s2207_s10  ;;  %v914_v50 = vsel %vm899_vm7, %v2808_v25, %v346_v51  ;;  %v1572_v25 = vld [vmem:[%s3531_s3 + $0x80] sm:$0xff] }
 0x185   : > { %2060 = vmatpush.msra.mxu1 %v1567_v23  ;;  %1705 = vmatpush.msra.mxu2 %v1579_v6 }
 0x186   : > { %v611_v48 = vpop.permute.xlu1 %610  ;;  %1636 = vmatpush.msrb.mxu0 %v1567_v23 }
 0x187   : > { %v522_v19 = vpop.permute.xlu0 %521  ;;  %2061 = vmatpush.msra.mxu1 %v1566_v28  ;;  %1706 = vmatpush.msra.mxu2 %v1578_v60 }
 0x188   : > { %v947_v53 = vsel %vm933_vm9, %v930_v17, %v522_v19  ;;  %1637 = vmatpush.msrb.mxu0 %v1566_v28  ;;  %v880_v52 = vpop.permute.xlu2 %879 }
 0x189   : > { %v964_v22 = vsel %vm950_vm10, %v947_v53, %v611_v48  ;;  %2062 = vmatpush.msra.mxu1 %v1565_v33  ;;  %1707 = vmatpush.msra.mxu2 %v1577_v37 }
 0x18a   : > { %v981_v1 = vsel %vm967_vm11, %v964_v22, %v3048_v49  ;;  %1638 = vmatpush.msrb.mxu0 %v1565_v33  ;;  %v1574_v49 = vld [vmem:[%s3531_s3 + $0x90] sm:$0xff] }
 0x18b   : > { %2041 = vmatmul.msk.f32.gmra.mxu3 %vm1523_vm15, %v1497_v11  ;;  %2063 = vmatpush.msra.mxu1 %v1564_v20 }
 0x18c   : > { %1301 = vrot.lane.b32.xlu2 %v1265_v24, %s2207_s10  ;;  %1708 = vmatpush.msra.mxu2 %v1576_v27 }
 0x18d   : > { %2064 = vmatpush.msra.mxu1 %v1563_v15  ;;  %1639 = vmatpush.msrb.mxu0 %v1564_v20 }
 0x18e   : > { %v878_v36 = vpop.permute.xlu1 %877  ;;  %v1109_v47 = vpop.f32.mrf.mxu0  ;;  %1709 = vmatpush.msra.mxu2 %v1575_v43 }
 0x18f   : > { %v789_v38 = vpop.permute.xlu0 %788  ;;  %v1110_v41 = vadd.f32 %v2871_v57, %v1109_v47  ;;  %2065 = vmatpush.msra.mxu1 %v1562_v44  ;;  %1640 = vmatpush.msrb.mxu0 %v1563_v15 }
 0x190   : > { %v998_v39 = vsel %vm984_vm12, %v981_v1, %v789_v38  ;;  %1710 = vmatpush.msra.mxu2 %v1574_v49  ;;  %v526_v37 = vpop.permute.xlu2 %525 }
 0x191   : > { %v1015_v34 = vsel %vm1001_vm13, %v998_v39, %v878_v36  ;;  %2066 = vmatpush.msra.mxu1 %v1561_v59  ;;  %1641 = vmatpush.msrb.mxu0 %v1562_v44  ;;  %v1145_v4 = vmax.f32 %v1110_v41, 0.0 }
 0x192   : > { %2033 = vmatmul.msk.f32.gmra.mxu0 %vm1025_vm14, %v1015_v34  ;;  %1711 = vmatpush.msra.mxu2 %v1573_v61  ;;  %v1339_v61 = vrot.slane %v2914_v40, 2 }
 0x193   : > { %2067 = vmatpush.msra.mxu1 %v1560_v26  ;;  %1642 = vmatpush.msrb.mxu0 %v1561_v59  ;;  %v1180_v3 = vrot.slane %v1145_v4, 6 }
 0x194   : > { %1712 = vmatpush.msra.mxu2 %v1572_v25 }
 0x195   : > { %2068 = vmatpush.msra.mxu1 %v1559_v2  ;;  %1643 = vmatpush.msrb.mxu0 %v1560_v26  ;;  %v3179_v19 = vsel %vm721_vm3, 0.0, %v1180_v3 }
 0x196   : > { %v524_v56 = vpop.permute.xlu1 %523  ;;  %v1498_v11 = vrot.slane %v3179_v19, 4  ;;  %v1410_v23 = vrot.slane %v3179_v19, 3  ;;  %v1266_v36 = vrot.slane %v3179_v19, 1 }
 0x197   : > { %v435_v62 = vpop.permute.xlu0 %434  ;;  %2069 = vmatpush.msra.mxu1 %v1558_v58  ;;  %1644 = vmatpush.msrb.mxu0 %v1559_v2 }
 0x198   : > { %v931_v63 = vsel %vm916_vm8, %v914_v50, %v435_v62  ;;  %v793_v41 = vpop.permute.xlu2 %792 }
 0x199   : > { %v948_v46 = vsel %vm933_vm9, %v931_v63, %v524_v56  ;;  %2070 = vmatpush.msra.mxu1 %v1557_v5  ;;  %1645 = vmatpush.msrb.mxu0 %v1558_v58  ;;  %v1340_v56 = vrot.slane %v2921_v45, 2 }
 0x19a   : > { %v965_v16 = vsel %vm950_vm10, %v948_v46, %v613_v12  ;;  %v1342_v46 = vrot.slane %v2928_v54, 2 }
 0x19b   : > { %2071 = vmatpush.msra.mxu1 %v1556_v8  ;;  %1646 = vmatpush.msrb.mxu0 %v1557_v5  ;;  %v1341_v26 = vsel %vm365_vm5, %v1339_v61, %v1340_v56 }
 0x19d   : > { %1647 = vmatpush.msrb.mxu0 %v1556_v8 }
 0x19e   : > { %v791_v42 = vpop.permute.xlu1 %790 }
 0x19f   : > { %v1112_v35 = vpop.f32.mrf.mxu0  ;;  %v702_v21 = vpop.permute.xlu0 %701 }
 0x1a0   : > { %v1113_v7 = vadd.f32 %v2871_v57, %v1112_v35  ;;  %v982_v48 = vsel %vm967_vm11, %v965_v16, %v702_v21 }
 0x1a1   : > { %v999_v18 = vsel %vm984_vm12, %v982_v48, %v791_v42 }
 0x1a2   : > { %v1146_v17 = vmax.f32 %v1113_v7, 0.0  ;;  %v1016_v55 = vsel %vm1001_vm13, %v999_v18, %v880_v52  ;;  %v1438_v52 = vpop.permute.xlu2 %1437 }
 0x1a3   : > { %2034 = vmatmul.msk.f32.gmra.mxu0 %vm1025_vm14, %v1016_v55 }
 0x1a4   : > { %v1181_v14 = vrot.slane %v1146_v17, 6 }
 0x1a6   : > { %v3184_v51 = vsel %vm721_vm3, %v1180_v3, %v1181_v14  ;;  %v3187_v53 = vsel %vm721_vm3, %v1181_v14, 0.0  ;;  %v437_v24 = vpop.permute.xlu1 %436  ;;  %v1343_v3 = vsel %vm365_vm5, %v1340_v56, %v1342_v46 }
 0x1a7   : > { %v1499_v6 = vrot.slane %v3184_v51, 4  ;;  %v1411_v28 = vrot.slane %v3184_v51, 3  ;;  %v1413_v22 = vrot.slane %v3187_v53, 3  ;;  %v1267_v60 = vrot.slane %v3184_v51, 1  ;;  %v348_v33 = vpop.permute.xlu0 %347 }
 0x1a8   : > { %v915_v27 = vsel %vm899_vm7, %v2811_v9, %v348_v33  ;;  %v1501_v34 = vrot.slane %v3187_v53, 4  ;;  %v1269_v43 = vrot.slane %v3187_v53, 1  ;;  %v1541_v35 = vsel %vm1523_vm15, %v1343_v3, %v1438_v52 }
 0x1a9   : > { %v1500_v1 = vsel %vm543_vm4, %v1498_v11, %v1499_v6  ;;  %v1414_v38 = vsel %vm454_vm1, %v1411_v28, %v1413_v22  ;;  %v1412_v39 = vsel %vm454_vm1, %v1410_v23, %v1411_v28  ;;  %v1268_v20 = vsel %vm276_vm2, %v1266_v36, %v1267_v60 }
 0x1aa   : > { %2042 = vmatmul.msk.f32.gmra.mxu3 %vm1523_vm15, %v1500_v1  ;;  %1449 = vrot.lane.b32.xlu2 %v1414_v38, %s2207_s10  ;;  %v932_v15 = vsel %vm916_vm8, %v915_v27, %v437_v24  ;;  %v1502_v49 = vsel %vm543_vm4, %v1499_v6, %v1501_v34  ;;  %v1270_v9 = vsel %vm276_vm2, %v1267_v60, %v1269_v43  ;;  %v1344_v27 = vrot.slane %v2979_v10, 2 }
 0x1ab   : > { %1447 = vrot.lane.b32.xlu0 %v1412_v39, %s2207_s10  ;;  %1303 = vrot.lane.b32.xlu1 %v1268_v20, %s2207_s10  ;;  %v949_v44 = vsel %vm933_vm9, %v932_v15, %v526_v37  ;;  %v1345_v37 = vrot.slane %v2986_v32, 2  ;;  %vm1934_vm7 = vcmask 1047559  }
 0x1ad   : > { %v1346_v15 = vsel %vm365_vm5, %v1344_v27, %v1345_v37 }
 0x1ae   : > { %v704_v12 = vpop.permute.xlu1 %703 }
 0x1af   : > { %v615_v47 = vpop.permute.xlu0 %614 }
 0x1b0   : > { %v966_v50 = vsel %vm950_vm10, %v949_v44, %v615_v47  ;;  %v1115_v58 = vpop.f32.mrf.mxu0  ;;  %v1347_v44 = vrot.slane %v2989_v0, 2 }
 0x1b1   : > { %v983_v59 = vsel %vm967_vm11, %v966_v50, %v704_v12  ;;  %v1116_v5 = vadd.f32 %v2871_v57, %v1115_v58 }
 0x1b2   : > { %2043 = vmatmul.msk.f32.gmra.mxu3 %vm1523_vm15, %v1502_v49  ;;  %v1000_v63 = vsel %vm984_vm12, %v983_v59, %v793_v41  ;;  %v1348_v41 = vsel %vm365_vm5, %v1345_v37, %v1347_v44 }
 0x1b3   : > { %1305 = vrot.lane.b32.xlu0 %v1270_v9, %s2207_s10  ;;  %v1147_v16 = vmax.f32 %v1116_v5, 0.0 }
 0x1b5   : > { %v1183_v21 = vrot.slane %v1147_v16, 6 }
 0x1b6   : > { %v1436_v62 = vpop.permute.xlu1 %1435 }
 0x1b7   : > { %v882_v25 = vpop.permute.xlu0 %881  ;;  %v1540_v2 = vsel %vm1523_vm15, %v1341_v26, %v1436_v62  ;;  %v3233_v18 = vsel %vm721_vm3, 0.0, %v1183_v21  ;;  %v1350_v62 = vrot.slane %v3041_v31, 2 }
 0x1b8   : > { %v1017_v4 = vsel %vm1001_vm13, %v1000_v63, %v882_v25  ;;  %1713 = vmatmul.f32.vlgmr.msra.gmra.mxu2 %v1540_v2  ;;  %v1503_v11 = vrot.slane %v3233_v18, 4  ;;  %v1415_v6 = vrot.slane %v3233_v18, 3  ;;  %v1271_v28 = vrot.slane %v3233_v18, 1 }
 0x1b9   : > { %2035 = vmatmul.msk.f32.gmra.mxu0 %vm1025_vm14, %v1017_v4  ;;  %v1349_v25 = vrot.slane %v3034_v29, 2 }
 0x1bb   : > { %v1351_v2 = vsel %vm365_vm5, %v1349_v25, %v1350_v62 }
 0x1bc   : > { %v1296_v8 = vpop.permute.xlu2 %1295 }
 0x1bd   : > { %v1526_v54 = vsel %vm1523_vm15, %v2979_v10, %v1296_v8 }
 0x1bf   : > { %v1294_v42 = vpop.permute.xlu0 %1293 }
 0x1c0   : > { %v1525_v7 = vsel %vm1523_vm15, %v2921_v45, %v1294_v42  ;;  %1716 = vmatmul.f32.gmra.mxu2 %v1541_v35  ;;  %v1352_v35 = vrot.slane %v3044_v30, 2 }
 0x1c1   : > { %1651 = vmatmul.f32.vlgmr.msra.gmra.mxu1 %v1525_v7 }
 0x1c6   : > { %v1118_v48 = vpop.f32.mrf.mxu0 }
 0x1c7   : > { %v1119_v17 = vadd.f32 %v2871_v57, %v1118_v48 }
 0x1c9   : > { %v1148_v55 = vmax.f32 %v1119_v17, 0.0  ;;  %1654 = vmatmul.f32.gmra.mxu1 %v1526_v54 }
 0x1cb   : > { %v1184_v14 = vrot.slane %v1148_v55, 6 }
 0x1cd   : > { %v3237_v23 = vsel %vm721_vm3, %v1183_v21, %v1184_v14  ;;  %v3240_v24 = vsel %vm721_vm3, %v1184_v14, 0.0 }
 0x1ce   : > { %v1504_v22 = vrot.slane %v3237_v23, 4  ;;  %v1416_v60 = vrot.slane %v3237_v23, 3  ;;  %v1418_v33 = vrot.slane %v3240_v24, 3  ;;  %v1272_v36 = vrot.slane %v3237_v23, 1 }
 0x1cf   : > { %v1506_v12 = vrot.slane %v3240_v24, 4  ;;  %v1274_v47 = vrot.slane %v3240_v24, 1 }
 0x1d0   : > { %v1505_v1 = vsel %vm543_vm4, %v1503_v11, %v1504_v22  ;;  %v1419_v38 = vsel %vm454_vm1, %v1416_v60, %v1418_v33  ;;  %v1417_v39 = vsel %vm454_vm1, %v1415_v6, %v1416_v60  ;;  %v1273_v20 = vsel %vm276_vm2, %v1271_v28, %v1272_v36 }
 0x1d1   : > { %2044 = vmatmul.msk.f32.gmra.mxu3 %vm1523_vm15, %v1505_v1  ;;  %1453 = vrot.lane.b32.xlu0 %v1419_v38, %s2207_s10  ;;  %v1507_v49 = vsel %vm543_vm4, %v1504_v22, %v1506_v12  ;;  %v1275_v10 = vsel %vm276_vm2, %v1272_v36, %v1274_v47  ;;  %v1353_v22 = vsel %vm365_vm5, %v1350_v62, %v1352_v35  ;;  %v1355_v62 = vrot.slane %v3184_v51, 2 }
 0x1d2   : > { %1451 = vrot.lane.b32.xlu1 %v1417_v39, %s2207_s10  ;;  %1307 = vrot.lane.b32.xlu2 %v1273_v20, %s2207_s10 }
 0x1d3   : > { %v1442_v50 = vpop.permute.xlu0 %1441 }
 0x1d4   : > { %v1440_v34 = vpop.permute.xlu1 %1439  ;;  %v1543_v61 = vsel %vm1523_vm15, %v1348_v41, %v1442_v50 }
 0x1d5   : > { %v1542_v43 = vsel %vm1523_vm15, %v1346_v15, %v1440_v34 }
 0x1d6   : > { %1719 = vmatmul.f32.gmra.mxu2 %v1542_v43 }
 0x1d7   : > { %v1121_v56 = vpop.f32.mrf.mxu0 }
 0x1d8   : > { %v1122_v0 = vadd.f32 %v2871_v57, %v1121_v56 }
 0x1d9   : > { %2045 = vmatmul.msk.f32.gmra.mxu3 %vm1523_vm15, %v1507_v49 }
 0x1da   : > { %1309 = vrot.lane.b32.xlu1 %v1275_v10, %s2207_s10  ;;  %v1149_v63 = vmax.f32 %v1122_v0, 0.0 }
 0x1dc   : > { %v1298_v9 = vpop.permute.xlu1 %1297  ;;  %v1186_v58 = vrot.slane %v1149_v63, 6 }
 0x1dd   : > { %v1527_v59 = vsel %vm1523_vm15, %v2986_v32, %v1298_v9 }
 0x1de   : > { %1657 = vmatmul.f32.gmra.mxu1 %v1527_v59  ;;  %1722 = vmatmul.f32.gmra.mxu2 %v1543_v61  ;;  %v1444_v26 = vpop.permute.xlu2 %1443  ;;  %v3278_v52 = vsel %vm721_vm3, 0.0, %v1186_v58 }
 0x1df   : > { %v1544_v4 = vsel %vm1523_vm15, %v1351_v2, %v1444_v26  ;;  %v1508_v42 = vrot.slane %v3278_v52, 4  ;;  %v1420_v21 = vrot.slane %v3278_v52, 3  ;;  %v1276_v8 = vrot.slane %v3278_v52, 1 }
 0x1e6   : > { %1725 = vmatmul.f32.gmra.mxu2 %v1544_v4  ;;  %v1302_v39 = vpop.permute.xlu2 %1301  ;;  %v1354_v4 = vrot.slane %v3179_v19, 2 }
 0x1e7   : > { %v1529_v27 = vsel %vm1523_vm15, %v3041_v31, %v1302_v39 }
 0x1e8   : > { %v1124_v46 = vpop.f32.mrf.mxu0 }
 0x1e9   : > { %v1125_v32 = vadd.f32 %v2871_v57, %v1124_v46 }
 0x1eb   : > { %v1150_v5 = vmax.f32 %v1125_v32, 0.0  ;;  %v1356_v32 = vsel %vm365_vm5, %v1354_v4, %v1355_v62  ;;  %v1359_v4 = vrot.slane %v3233_v18, 2 }
 0x1ed   : > { %v1187_v3 = vrot.slane %v1150_v5, 6 }
 0x1ef   : > { %v3283_v7 = vsel %vm721_vm3, %v1186_v58, %v1187_v3  ;;  %v3286_v16 = vsel %vm721_vm3, %v1187_v3, 0.0 }
 0x1f0   : > { %v1509_v48 = vrot.slane %v3283_v7, 4  ;;  %v1421_v17 = vrot.slane %v3283_v7, 3  ;;  %v1423_v54 = vrot.slane %v3286_v16, 3  ;;  %v1277_v55 = vrot.slane %v3283_v7, 1 }
 0x1f1   : > { %v1511_v37 = vrot.slane %v3286_v16, 4  ;;  %v1279_v1 = vrot.slane %v3286_v16, 1 }
 0x1f2   : > { %v1510_v30 = vsel %vm543_vm4, %v1508_v42, %v1509_v48  ;;  %v1424_v14 = vsel %vm454_vm1, %v1421_v17, %v1423_v54  ;;  %v1422_v11 = vsel %vm454_vm1, %v1420_v21, %v1421_v17  ;;  %v1278_v6 = vsel %vm276_vm2, %v1276_v8, %v1277_v55 }
 0x1f3   : > { %2046 = vmatmul.msk.f32.gmra.mxu3 %vm1523_vm15, %v1510_v30  ;;  %1457 = vrot.lane.b32.xlu1 %v1424_v14, %s2207_s10  ;;  %v1512_v38 = vsel %vm543_vm4, %v1509_v48, %v1511_v37  ;;  %v1280_v20 = vsel %vm276_vm2, %v1277_v55, %v1279_v1  ;;  %v1357_v21 = vrot.slane %v3187_v53, 2 }
 0x1f4   : > { %1455 = vrot.lane.b32.xlu2 %v1422_v11, %s2207_s10  ;;  %1311 = vrot.lane.b32.xlu0 %v1278_v6, %s2207_s10  ;;  %v2135_v6 = vld [vmem:[%s3530_s2] ss:$0 sm:$0xff] }
 0x1f5   : > { %v1446_v28 = vpop.permute.xlu1 %1445  ;;  %v1358_v54 = vsel %vm365_vm5, %v1355_v62, %v1357_v21 }
 0x1f6   : > { %v1300_v60 = vpop.permute.xlu0 %1299  ;;  %v1545_v33 = vsel %vm1523_vm15, %v1353_v22, %v1446_v28 }
 0x1f7   : > { %v1528_v36 = vsel %vm1523_vm15, %v3034_v29, %v1300_v60  ;;  %1728 = vmatmul.f32.gmra.mxu2 %v1545_v33 }
 0x1f8   : > { %1660 = vmatmul.f32.gmra.mxu1 %v1528_v36 }
 0x1fb   : > { %2047 = vmatmul.msk.f32.gmra.mxu3 %vm1523_vm15, %v1512_v38 }
 0x1fc   : > { %1313 = vrot.lane.b32.xlu2 %v1280_v20, %s2207_s10 }
 0x1fe   : > { %v1127_v29 = vpop.f32.mrf.mxu0 }
 0x1ff   : > { %v1128_v34 = vadd.f32 %v2871_v57, %v1127_v29 }
 0x200   : > { %1663 = vmatmul.f32.gmra.mxu1 %v1529_v27 }
 0x201   : > { %v1151_v15 = vmax.f32 %v1128_v34, 0.0 }
 0x203   : > { %v1189_v43 = vrot.slane %v1151_v15, 6  ;;  %v3379_v15 = vld [vmem:[%s3532_s4] ss:$0 sm:$0xff] }
 0x204   : > { %v1450_v48 = vpop.permute.xlu2 %1449 }
 0x205   : > { %v3317_v44 = vsel %vm721_vm3, 0.0, %v1189_v43  ;;  %v1547_v30 = vsel %vm1523_vm15, %v1358_v54, %v1450_v48  ;;  %v1365_v54 = vrot.slane %v3283_v7, 2 }
 0x206   : > { %v1513_v10 = vrot.slane %v3317_v44, 4  ;;  %v1425_v41 = vrot.slane %v3317_v44, 3  ;;  %v1281_v56 = vrot.slane %v3317_v44, 1 }
 0x20f   : > { %v1130_v12 = vpop.f32.mrf.mxu0 }
 0x210   : > { %v1131_v47 = vadd.f32 %v2871_v57, %v1130_v12 }
 0x212   : > { %v1152_v49 = vmax.f32 %v1131_v47, 0.0 }
 0x214   : > { %v1190_v50 = vrot.slane %v1152_v49, 6 }
 0x216   : > { %v3321_v9 = vsel %vm721_vm3, %v1189_v43, %v1190_v50  ;;  %v3324_v31 = vsel %vm721_vm3, %v1190_v50, 0.0  ;;  %v1251_v50 = vrot.slane %v2914_v40, 1 }
 0x217   : > { %v1514_v59 = vrot.slane %v3321_v9, 4  ;;  %v1426_v57 = vrot.slane %v3321_v9, 3  ;;  %v1428_v61 = vrot.slane %v3324_v31, 3  ;;  %v1282_v0 = vrot.slane %v3321_v9, 1 }
 0x218   : > { %v1516_v42 = vrot.slane %v3324_v31, 4  ;;  %v1284_v35 = vrot.slane %v3324_v31, 1 }
 0x219   : > { %v1515_v26 = vsel %vm543_vm4, %v1513_v10, %v1514_v59  ;;  %v1429_v25 = vsel %vm454_vm1, %v1426_v57, %v1428_v61  ;;  %v1427_v63 = vsel %vm454_vm1, %v1425_v41, %v1426_v57  ;;  %v1283_v2 = vsel %vm276_vm2, %v1281_v56, %v1282_v0 }
 0x21a   : > { %2048 = vmatmul.msk.f32.gmra.mxu3 %vm1523_vm15, %v1515_v26  ;;  %1461 = vrot.lane.b32.xlu2 %v1429_v25, %s2207_s10  ;;  %v1517_v8 = vsel %vm543_vm4, %v1514_v59, %v1516_v42  ;;  %v1285_v17 = vsel %vm276_vm2, %v1282_v0, %v1284_v35  ;;  %v1360_v61 = vrot.slane %v3237_v23, 2  ;;  %v1253_v0 = vsel %vm276_vm2, %v1251_v50, %v1252_v13 }
 0x21b   : > { %1459 = vrot.lane.b32.xlu0 %v1427_v63, %s2207_s10  ;;  %1315 = vrot.lane.b32.xlu1 %v1283_v2, %s2207_s10 }
 0x21c   : > { %v1361_v45 = vsel %vm365_vm5, %v1359_v4, %v1360_v61 }
 0x21d   : > { %v1304_v58 = vpop.permute.xlu1 %1303  ;;  %v1448_v46 = vpop.permute.xlu0 %1447 }
 0x21e   : > { %v1530_v5 = vsel %vm1523_vm15, %v3179_v19, %v1304_v58  ;;  %v1546_v3 = vsel %vm1523_vm15, %v1356_v32, %v1448_v46 }
 0x21f   : > { %1666 = vmatmul.f32.gmra.mxu1 %v1530_v5  ;;  %1731 = vmatmul.f32.gmra.mxu2 %v1546_v3  ;;  %v3407_v3 = vpop.f32.mrf.mxu3 }
 0x220   : > { %v1133_v53 = vpop.f32.mrf.mxu0 }
 0x221   : > { %v1134_v28 = vadd.f32 %v2135_v6, %v1133_v53 }
 0x222   : > { %2049 = vmatmul.msk.f32.gmra.mxu3 %vm1523_vm15, %v1517_v8 }
 0x223   : > { %1317 = vrot.lane.b32.xlu0 %v1285_v17, %s2207_s10  ;;  %v1153_v22 = vmax.f32 %v1134_v28, 0.0 }
 0x225   : > { %v1306_v19 = vpop.permute.xlu0 %1305  ;;  %v1192_v60 = vrot.slane %v1153_v22, 6 }
 0x226   : > { %v1531_v55 = vsel %vm1523_vm15, %v3184_v51, %v1306_v19 }
 0x227   : > { %1669 = vmatmul.f32.gmra.mxu1 %v1531_v55  ;;  %1734 = vmatmul.f32.gmra.mxu2 %v1547_v30  ;;  %v3363_v37 = vsel %vm721_vm3, 0.0, %v1192_v60  ;;  %v3416_v19 = vpop.f32.mrf.mxu3 }
 0x228   : > { %v1518_v27 = vrot.slane %v3363_v37, 4  ;;  %v1286_v29 = vrot.slane %v3363_v37, 1  ;;  %v1430_v41 = vrot.slane %v3363_v37, 3 }
 0x22c   : > { %v1308_v14 = vpop.permute.xlu2 %1307 }
 0x22d   : > { %v1532_v11 = vsel %vm1523_vm15, %v3233_v18, %v1308_v14  ;;  %v1362_v18 = vrot.slane %v3240_v24, 2  ;;  %v1364_v24 = vrot.slane %v3278_v52, 2 }
 0x22f   : > { %1672 = vmatmul.f32.gmra.mxu1 %v1532_v11  ;;  %v1363_v8 = vsel %vm365_vm5, %v1360_v61, %v1362_v18  ;;  %v1366_v53 = vsel %vm365_vm5, %v1364_v24, %v1365_v54 }
 0x236   : > { %v1136_v33 = vpop.f32.mrf.mxu0 }
 0x237   : > { %v1137_v36 = vadd.f32 %v2135_v6, %v1136_v33 }
 0x239   : > { %v1154_v51 = vmax.f32 %v1137_v36, 0.0 }
 0x23b   : > { %v1193_v1 = vrot.slane %v1154_v51, 6  ;;  %v3365_v38 = vpop.f32.mrf.mxu2 }
 0x23d   : > { %v3368_v39 = vsel %vm721_vm3, %v1192_v60, %v1193_v1  ;;  %v3371_v20 = vsel %vm721_vm3, %v1193_v1, 0.0  ;;  %v1367_v1 = vrot.slane %v3286_v16, 2  ;;  %vm1926_vm3 = vcmask 1043459  }
 0x23e   : > { %v1433_v34 = vrot.slane %v3371_v20, 3  ;;  %v1519_v43 = vrot.slane %v3368_v39, 4  ;;  %v1287_v12 = vrot.slane %v3368_v39, 1  ;;  %v1289_v47 = vrot.slane %v3371_v20, 1  ;;  %v1652_v49 = vpop.f32.mrf.mxu1 }
 0x23f   : > { %v1431_v10 = vrot.slane %v3368_v39, 3  ;;  %v1653_v25 = vadd.f32 %v3379_v15, %v1652_v49  ;;  %v1521_v13 = vrot.slane %v3371_v20, 4 }
 0x240   : > { %v1520_v56 = vsel %vm543_vm4, %v1518_v27, %v1519_v43  ;;  %v1290_v59 = vsel %vm276_vm2, %v1287_v12, %v1289_v47  ;;  %v1288_v57 = vsel %vm276_vm2, %v1286_v29, %v1287_v12  ;;  %v1368_v47 = vsel %vm365_vm5, %v1365_v54, %v1367_v1 }
 0x241   : > { %2050 = vmatmul.msk.f32.gmra.mxu3 %vm1523_vm15, %v1520_v56  ;;  %1321 = vrot.lane.b32.xlu0 %v1290_v59, %s2207_s10  ;;  %v1434_v62 = vsel %vm454_vm1, %v1431_v10, %v1433_v34  ;;  %v1432_v26 = vsel %vm454_vm1, %v1430_v41, %v1431_v10  ;;  %v1522_v42 = vsel %vm543_vm4, %v1519_v43, %v1521_v13  ;;  %vm1922_vm1 = vcmask 1041409  }
 0x242   : > { %v2126_v63 = vpack.i.bf16 %v1434_v62, %v1253_v0  ;;  %v2121_v2 = vpack.i.bf16 %v1288_v57, %v1432_v26  ;;  %vm1924_vm2 = vcmask 1042434   ;;  %vm1928_vm4 = vcmask 1044484  }
 0x243   : > { %v1717_v58 = vpop.f32.mrf.mxu2  ;;  %v1454_v35 = vpop.permute.xlu0 %1453 }
 0x244   : > { %v1452_v46 = vpop.permute.xlu1 %1451  ;;  %2127 = vrot.lane.b32.xlu2 %v2126_v63, %s2207_s10  ;;  %2122 = vrot.lane.b32.xlu1 %v2121_v2, %s2207_s10  ;;  %v3402_v32 = vadd.f32 %v1717_v58, %v1653_v25  ;;  %v1549_v17 = vsel %vm1523_vm15, %v1363_v8, %v1454_v35  ;;  %s218_s10 = sand.u32 1, %s2190_s19  }
 0x245   : > { %v1548_v5 = vsel %vm1523_vm15, %v1361_v45, %v1452_v46  ;;  %s2017_s23 = sshll.u32 %s218_s10, 3  ;;  %s1939_s30 = scalar_lea.sflag [#allocation3], %s218_s10 }
 0x246   : > { %1737 = vmatmul.f32.gmra.mxu2 %v1548_v5  ;;  %v1655_v30 = vpop.f32.mrf.mxu1  ;;  %v1369_v5 = vrot.slane %v3317_v44, 2  ;;  %s220_s7 = scalar_lea.vmem [#allocation2], %s2017_s23 }
 0x247   : > { %v1656_v11 = vadd.f32 %v3379_v15, %v1655_v30  ;;  %s1951_s8 = sshll.u32 %s220_s7, 4  ;;  %s1952_s8 = int_to_ptr.vmem [resolvable:$true] %s1951_s8 }
 0x249   : > { %2051 = vmatmul.msk.f32.gmra.mxu3 %vm1523_vm15, %v1522_v42 }
 0x24c   : > { %v1310_v21 = vpop.permute.xlu1 %1309 }
 0x24d   : > { %v1533_v48 = vsel %vm1523_vm15, %v3237_v23, %v1310_v21  ;;  %v1785_v23 = vpop.f32.mrf.mxu3 }
 0x24e   : > { %1675 = vmatmul.f32.gmra.mxu1 %v1533_v48  ;;  %1740 = vmatmul.f32.gmra.mxu2 %v1549_v17  ;;  %v1456_v55 = vpop.permute.xlu2 %1455  ;;  %v1372_v48 = vrot.slane %v3324_v31, 2 }
 0x24f   : > { %v1550_v14 = vsel %vm1523_vm15, %v1366_v53, %v1456_v55 }
 0x255   : > { %v1788_v27 = vpop.f32.mrf.mxu3 }
 0x256   : > { %1743 = vmatmul.f32.gmra.mxu2 %v1550_v14  ;;  %v1314_v56 = vpop.permute.xlu2 %1313 }
 0x257   : > { %v1535_v16 = vsel %vm1523_vm15, %v3283_v7, %v1314_v56  ;;  %v1370_v7 = vrot.slane %v3321_v9, 2 }
 0x259   : > { %v1720_v6 = vpop.f32.mrf.mxu2  ;;  %v1371_v35 = vsel %vm365_vm5, %v1369_v5, %v1370_v7  ;;  %v1373_v55 = vsel %vm365_vm5, %v1370_v7, %v1372_v48 }
 0x25a   : > { %v1721_v28 = vadd.f32 %v1720_v6, %v1656_v11 }
 0x25b   : > { %v1658_v22 = vpop.f32.mrf.mxu1 }
 0x25c   : > { %v1659_v60 = vadd.f32 %v3379_v15, %v1658_v22  ;;  %v1786_v36 = vadd.f32 %v1785_v23, %v1721_v28 }
 0x25d   : > { %v1791_v61 = vpop.f32.mrf.mxu3 }
 0x25e   : > { %v1829_v34 = vmax.f32 %v1786_v36, 0.0 }
 0x261   : > { %v1723_v33 = vpop.f32.mrf.mxu2 }
 0x262   : > { %v1724_v51 = vadd.f32 %v1723_v33, %v1659_v60  ;;  %v1375_v60 = vrot.slane %v3368_v39, 2  ;;  %v1374_v33 = vrot.slane %v3363_v37, 2 }
 0x264   : > { %v1789_v29 = vadd.f32 %v1788_v27, %v1724_v51  ;;  %v1376_v1 = vsel %vm365_vm5, %v1374_v33, %v1375_v60 }
 0x265   : > { %v1458_v12 = vpop.permute.xlu1 %1457 }
 0x266   : > { %v1830_v43 = vmax.f32 %v1789_v29, 0.0  ;;  %v1312_v49 = vpop.permute.xlu0 %1311  ;;  %v1551_v50 = vsel %vm1523_vm15, %v1368_v47, %v1458_v12 }
 0x267   : > { %v1534_v41 = vsel %vm1523_vm15, %v3278_v52, %v1312_v49  ;;  %1746 = vmatmul.f32.gmra.mxu2 %v1551_v50  ;;  %v1794_v52 = vpop.f32.mrf.mxu3 }
 0x268   : > { %v3427_v10 = vadd.f32 %v1830_v43, %v1829_v34  ;;  %1678 = vmatmul.f32.gmra.mxu1 %v1534_v41 }
 0x269   : > { %v1726_v0 = vpop.f32.mrf.mxu2 }
 0x26a   : > { %v1851_v7 = vrot.slane %v3427_v10, 4 }
 0x26c   : > { %v1852_v48 = vadd.f32 %v1851_v7, %v3427_v10 }
 0x26f   : > { %v1797_v28 = vpop.f32.mrf.mxu3 }
 0x270   : > { %1681 = vmatmul.f32.gmra.mxu1 %v1535_v16 }
 0x274   : > { %v1462_v17 = vpop.permute.xlu2 %1461 }
 0x275   : > { %v1661_v59 = vpop.f32.mrf.mxu1  ;;  %v1553_v30 = vsel %vm1523_vm15, %v1373_v55, %v1462_v17 }
 0x276   : > { %v1662_v57 = vadd.f32 %v3379_v15, %v1661_v59 }
 0x278   : > { %v1727_v62 = vadd.f32 %v1726_v0, %v1662_v57 }
 0x27a   : > { %v1729_v63 = vpop.f32.mrf.mxu2  ;;  %v1792_v2 = vadd.f32 %v1791_v61, %v1727_v62 }
 0x27c   : > { %v1831_v46 = vmax.f32 %v1792_v2, 0.0 }
 0x27d   : > { %v1664_v26 = vpop.f32.mrf.mxu1 }
 0x27e   : > { %v1665_v25 = vadd.f32 %v3379_v15, %v1664_v26 }
 0x280   : > { %v1730_v4 = vadd.f32 %v1729_v63, %v1665_v25 }
 0x282   : > { %v1795_v58 = vadd.f32 %v1794_v52, %v1730_v4  ;;  %v2208_v4 = vmov 16.0  }
 0x283   : > { %2133 = vrcp.f32 %v2208_v4 }
 0x284   : > { %v1832_v45 = vmax.f32 %v1795_v58, 0.0 }
 0x286   : > { %v3435_v13 = vadd.f32 %v1832_v45, %v1831_v46 }
 0x288   : > { %v1858_v5 = vrot.slane %v3435_v13, 4 }
 0x28d   : > { %v1316_v42 = vpop.permute.xlu1 %1315  ;;  %v1460_v18 = vpop.permute.xlu0 %1459 }
 0x28e   : > { %v1536_v21 = vsel %vm1523_vm15, %v3317_v44, %v1316_v42  ;;  %v1552_v8 = vsel %vm1523_vm15, %v1371_v35, %v1460_v18  ;;  %v2134_v18 = vpop.eup %2133 }
 0x28f   : > { %1684 = vmatmul.f32.gmra.mxu1 %v1536_v21  ;;  %1749 = vmatmul.f32.gmra.mxu2 %v1552_v8  ;;  %v1783_v8 = vadd.f32 %v3416_v19, %v3402_v32  ;;  %vm1904_vm0 = vweird.f32 %v2134_v18 }
 0x295   : > { %v1318_v54 = vpop.permute.xlu0 %1317 }
 0x296   : > { %v1537_v24 = vsel %vm1523_vm15, %v3321_v9, %v1318_v54 }
 0x297   : > { %1687 = vmatmul.f32.gmra.mxu1 %v1537_v24  ;;  %1752 = vmatmul.f32.gmra.mxu2 %v1553_v30  ;;  %v1900_v24 = vmul.f32 16.0, %v2134_v18  ;;  %v1859_v30 = vadd.f32 %v1858_v5, %v3435_v13 }
 0x29c   : > { %v1667_v53 = vpop.f32.mrf.mxu1 }
 0x29d   : > { %v1668_v11 = vadd.f32 %v3379_v15, %v1667_v53 }
 0x29e   : > { %v2128_v14 = vpop.permute.xlu2 %2127 }
 0x29f   : > { %v2129_v44 = vunpack.i.l.bf16 %v2128_v14  ;;  %v2130_v34 = vunpack.i.h.bf16 %v2128_v14 }
 0x2a1   : > { %v1524_v23 = vsel %vm1523_vm15, %v2914_v40, %v2129_v44  ;;  %v1377_v40 = vrot.slane %v3371_v20, 2 }
 0x2a2   : > { %v1732_v31 = vpop.f32.mrf.mxu2  ;;  %1648 = vmatmul.f32.vlgmr.msrb.gmra.mxu0 %v1524_v23  ;;  %v1853_v23 = vrot.slane %v1852_v48, 2 }
 0x2a3   : > { %v1733_v6 = vadd.f32 %v1732_v31, %v1668_v11  ;;  %v1378_v12 = vsel %vm365_vm5, %v1375_v60, %v1377_v40  ;;  %v1828_v11 = vmax.f32 %v1783_v8, 0.0  ;;  %vm1930_vm5 = vcmask 1045509  }
 0x2a4   : > { %v1555_v49 = vsel %vm1523_vm15, %v1378_v12, %v2130_v34  ;;  %v1670_v50 = vpop.f32.mrf.mxu1  ;;  %v1854_v10 = vadd.f32 %v1853_v23, %v1852_v48 }
 0x2a5   : > { %v1798_v22 = vadd.f32 %v1797_v28, %v1733_v6  ;;  %v1671_v61 = vadd.f32 %v3379_v15, %v1670_v50  ;;  %v1901_v6 = vsub.f32 1.0, %v1900_v24  ;;  %v1860_v28 = vrot.slane %v1859_v30, 2 }
 0x2a6   : > { %v1855_v34 = vrot.slane %v1854_v10, 1 }
 0x2a7   : > { %v1833_v52 = vmax.f32 %v1798_v22, 0.0  ;;  %v1902_v33 = vmul.f32 %v2134_v18, %v1901_v6  ;;  %v1861_v13 = vadd.f32 %v1860_v28, %v1859_v30 }
 0x2a9   : > { %v1862_v50 = vrot.slane %v1861_v13, 1 }
 0x2aa   : > { %v1735_v41 = vpop.f32.mrf.mxu2 }
 0x2ab   : > { %v1736_v62 = vadd.f32 %v1735_v41, %v1671_v61 }
 0x2ac   : > { %v1673_v56 = vpop.f32.mrf.mxu1 }
 0x2b3   : > { %v1322_v43 = vpop.permute.xlu0 %1321 }
 0x2b4   : > { %v1539_v47 = vsel %vm1523_vm15, %v3368_v39, %v1322_v43 }
 0x2b6   : > { %v2123_v9 = vpop.permute.xlu1 %2122 }
 0x2b7   : > { %v2125_v36 = vunpack.i.h.bf16 %v2123_v9  ;;  %v2124_v51 = vunpack.i.l.bf16 %v2123_v9 }
 0x2b9   : > { %v1538_v27 = vsel %vm1523_vm15, %v3363_v37, %v2125_v36  ;;  %v1554_v29 = vsel %vm1523_vm15, %v1376_v1, %v2124_v51  ;;  %v1800_v37 = vpop.f32.mrf.mxu3  ;;  %v1674_v36 = vadd.f32 %v3379_v15, %v1673_v56 }
 0x2ba   : > { %1690 = vmatmul.f32.gmra.mxu1 %v1538_v27  ;;  %1755 = vmatmul.f32.gmra.mxu2 %v1554_v29  ;;  %v1801_v25 = vadd.f32 %v1800_v37, %v1736_v62 }
 0x2bc   : > { %v1834_v2 = vmax.f32 %v1801_v25, 0.0  ;;  %v1856_v25 = vadd.f32 %v1855_v34, %v1854_v10 }
 0x2be   : > { %v1864_v46 = vadd.f32 %v1834_v2, %v1833_v52  ;;  %v1863_v52 = vadd.f32 %v1862_v50, %v1861_v13 }
 0x2c0   : > { %v1865_v35 = vrot.slane %v1864_v46, 4 }
 0x2c1   : > { %v3462_v59 = vpop.f32.mrf.mxu3 }
 0x2c2   : > { %1693 = vmatmul.f32.gmra.mxu1 %v1539_v47  ;;  %1758 = vmatmul.f32.gmra.mxu2 %v1555_v49  ;;  %v1866_v53 = vadd.f32 %v1865_v35, %v1864_v46  ;;  %v1903_v49 = vadd.f32 %v2134_v18, %v1902_v33 }
 0x2c4   : > { %v1867_v22 = vrot.slane %v1866_v53, 2  ;;  %v3483_v4 = vsel %vm1904_vm0, %v2134_v18, %v1903_v49 }
 0x2c5   : > { %v1908_v18 = vmul.f32 %v3483_v4, %v1863_v52 }
 0x2c9   : > { %v1738_v16 = vpop.f32.mrf.mxu2  ;;  %v1806_v0 = vpop.f32.mrf.mxu3 }
 0x2ca   : > { %v1739_v40 = vadd.f32 %v1738_v16, %v1674_v36 }
 0x2cb   : > { %v1676_v57 = vpop.f32.mrf.mxu1 }
 0x2cc   : > { %v1677_v19 = vadd.f32 %v3379_v15, %v1676_v57 }
 0x2d1   : > { %v1741_v20 = vpop.f32.mrf.mxu2  ;;  %v3465_v63 = vpop.f32.mrf.mxu3 }
 0x2d2   : > { %v1742_v51 = vadd.f32 %v1741_v20, %v1677_v19  ;;  %v1804_v20 = vadd.f32 %v3462_v59, %v1739_v40  ;;  %v1907_v59 = vmul.f32 %v3483_v4, %v1856_v25 }
 0x2d4   : > { %v1807_v41 = vadd.f32 %v1806_v0, %v1742_v51 }
 0x2d9   : > { %v1744_v39 = vpop.f32.mrf.mxu2  ;;  %v1812_v17 = vpop.f32.mrf.mxu3 }
 0x2e1   : > { %v1815_v60 = vpop.f32.mrf.mxu3 }
 0x2e5   : > { %v1679_v26 = vpop.f32.mrf.mxu1 }
 0x2e6   : > { %v1680_v1 = vadd.f32 %v3379_v15, %v1679_v26 }
 0x2e8   : > { %v1745_v61 = vadd.f32 %v1744_v39, %v1680_v1  ;;  %v1835_v39 = vmax.f32 %v1804_v20, 0.0 }
 0x2e9   : > { %v1818_v0 = vpop.f32.mrf.mxu3 }
 0x2ea   : > { %v1747_v45 = vpop.f32.mrf.mxu2  ;;  %v1810_v7 = vadd.f32 %v3465_v63, %v1745_v61 }
 0x2ed   : > { %v1682_v58 = vpop.f32.mrf.mxu1 }
 0x2f1   : > { %v1821_v23 = vpop.f32.mrf.mxu3 }
 0x30c   : > { %v1685_v54 = vpop.f32.mrf.mxu1 }
 0x30d   : > { %v1686_v62 = vadd.f32 %v3379_v15, %v1685_v54 }
 0x312   : > { %v1750_v14 = vpop.f32.mrf.mxu2 }
 0x313   : > { %v1751_v46 = vadd.f32 %v1750_v14, %v1686_v62 }
 0x314   : > { %v1688_v27 = vpop.f32.mrf.mxu1 }
 0x315   : > { %v1689_v37 = vadd.f32 %v3379_v15, %v1688_v27  ;;  %v1816_v48 = vadd.f32 %v1815_v60, %v1751_v46  ;;  %v1824_v27 = vpop.f32.mrf.mxu3 }
 0x31a   : > { %v1753_v12 = vpop.f32.mrf.mxu2 }
 0x31b   : > { %v1754_v26 = vadd.f32 %v1753_v12, %v1689_v37 }
 0x31f   : > { %v1649_v42 = vpop.f32.mrf.mxu0 }
 0x320   : > { %v1650_v21 = vadd.f32 %v3379_v15, %v1649_v42  ;;  %v1819_v42 = vadd.f32 %v1818_v0, %v1754_v26 }
 0x322   : > { %v1715_v55 = vadd.f32 %v3365_v38, %v1650_v21  ;;  %v1683_v38 = vadd.f32 %v3379_v15, %v1682_v58  ;;  %v1836_v58 = vmax.f32 %v1807_v41, 0.0  ;;  %v1840_v24 = vmax.f32 %v1819_v42, 0.0 }
 0x324   : > { %v1780_v44 = vadd.f32 %v3407_v3, %v1715_v55  ;;  %v1868_v3 = vadd.f32 %v1867_v22, %v1866_v53  ;;  %v1748_v43 = vadd.f32 %v1747_v45, %v1683_v38  ;;  %v1871_v8 = vadd.f32 %v1836_v58, %v1835_v39 }
 0x325   : > { %v1837_v55 = vmax.f32 %v1810_v7, 0.0 }
 0x326   : > { %v1827_v31 = vmax.f32 %v1780_v44, 0.0  ;;  %v1869_v57 = vrot.slane %v1868_v3, 1  ;;  %v1813_v16 = vadd.f32 %v1812_v17, %v1748_v43  ;;  %v1872_v44 = vrot.slane %v1871_v8, 4 }
 0x328   : > { %v1843_v32 = vadd.f32 %v1828_v11, %v1827_v31  ;;  %v1870_v45 = vadd.f32 %v1869_v57, %v1868_v3  ;;  %v1838_v35 = vmax.f32 %v1813_v16, 0.0  ;;  %v1839_v11 = vmax.f32 %v1816_v48, 0.0 }
 0x329   : > { %v1873_v22 = vadd.f32 %v1872_v44, %v1871_v8 }
 0x32a   : > { %v1844_v9 = vrot.slane %v1843_v32, 4  ;;  %v1909_v54 = vmul.f32 %v3483_v4, %v1870_v45  ;;  %v1878_v53 = vadd.f32 %v1838_v35, %v1837_v55  ;;  %v1885_v31 = vadd.f32 %v1840_v24, %v1839_v11 }
 0x32c   : > { %v1845_v29 = vadd.f32 %v1844_v9, %v1843_v32  ;;  %v1879_v28 = vrot.slane %v1878_v53, 4  ;;  %v1886_v19 = vrot.slane %v1885_v31, 4  ;;  %v1874_v9 = vrot.slane %v1873_v22, 2 }
 0x32e   : > { %v1846_v47 = vrot.slane %v1845_v29, 2  ;;  %v1880_v60 = vadd.f32 %v1879_v28, %v1878_v53  ;;  %v1887_v13 = vadd.f32 %v1886_v19, %v1885_v31 }
 0x330   : > { %v1847_v56 = vadd.f32 %v1846_v47, %v1845_v29  ;;  %v1881_v51 = vrot.slane %v1880_v60, 2  ;;  %v1875_v29 = vadd.f32 %v1874_v9, %v1873_v22  ;;  %v1888_v34 = vrot.slane %v1887_v13, 2 }
 0x332   : > { %v1848_v2 = vrot.slane %v1847_v56, 1  ;;  %v1882_v43 = vadd.f32 %v1881_v51, %v1880_v60  ;;  %v1876_v49 = vrot.slane %v1875_v29, 1  ;;  %v1889_v41 = vadd.f32 %v1888_v34, %v1887_v13 }
 0x334   : > { %v1849_v5 = vadd.f32 %v1848_v2, %v1847_v56  ;;  %v1883_v37 = vrot.slane %v1882_v43, 1  ;;  %v1890_v56 = vrot.slane %v1889_v41, 1 }
 0x336   : > { %v1906_v21 = vmul.f32 %v3483_v4, %v1849_v5  ;;  %v1884_v20 = vadd.f32 %v1883_v37, %v1882_v43  ;;  %v1891_v16 = vadd.f32 %v1890_v56, %v1889_v41 }
 0x337   : > { %v1691_v17 = vpop.f32.mrf.mxu1 }
 0x338   : > { %v1923_v63 = vsel %vm1922_vm1, %v1907_v59, %v1906_v21  ;;  %v1692_v32 = vadd.f32 %v3379_v15, %v1691_v17  ;;  %v1911_v58 = vmul.f32 %v3483_v4, %v1884_v20  ;;  %v1912_v45 = vmul.f32 %v3483_v4, %v1891_v16 }
 0x339   : > { %v1925_v30 = vsel %vm1924_vm2, %v1908_v18, %v1923_v63 }
 0x33a   : > { %v1927_v14 = vsel %vm1926_vm3, %v1909_v54, %v1925_v30 }
 0x33d   : > { %v1756_v6 = vpop.f32.mrf.mxu2 }
 0x33e   : > { %v1757_v38 = vadd.f32 %v1756_v6, %v1692_v32 }
 0x33f   : > { %v1694_v10 = vpop.f32.mrf.mxu1 }
 0x340   : > { %v1695_v33 = vadd.f32 %v3379_v15, %v1694_v10  ;;  %v1822_v3 = vadd.f32 %v1821_v23, %v1757_v38  ;;  %v1877_v15 = vadd.f32 %v1876_v49, %v1875_v29 }
 0x342   : > { %v1841_v12 = vmax.f32 %v1822_v3, 0.0  ;;  %v1910_v26 = vmul.f32 %v3483_v4, %v1877_v15 }
 0x344   : > { %v1929_v2 = vsel %vm1928_vm4, %v1910_v26, %v1927_v14 }
 0x345   : > { %v1759_v36 = vpop.f32.mrf.mxu2  ;;  %v1931_v0 = vsel %vm1930_vm5, %v1911_v58, %v1929_v2 }
 0x346   : > { %v1760_v1 = vadd.f32 %v1759_v36, %v1695_v33  ;;  %v1933_v5 = vsel %vm1932_vm6, %v1912_v45, %v1931_v0 }
 0x348   : > { %v1825_v40 = vadd.f32 %v1824_v27, %v1760_v1 }
 0x34a   : > { %v1842_v47 = vmax.f32 %v1825_v40, 0.0 }
 0x34c   : > { %v1892_v50 = vadd.f32 %v1842_v47, %v1841_v12 }
 0x34e   : > { %v1893_v57 = vrot.slane %v1892_v50, 4 }
 0x350   : > { %v1894_v61 = vadd.f32 %v1893_v57, %v1892_v50 }
 0x352   : > { %v1895_v62 = vrot.slane %v1894_v61, 2 }
 0x354   : > { %v1896_v25 = vadd.f32 %v1895_v62, %v1894_v61 }
 0x356   : > { %v1897_v52 = vrot.slane %v1896_v25, 1 }
 0x358   : > { %v1898_v46 = vadd.f32 %v1897_v52, %v1896_v25 }
 0x35a   : > { %v1913_v7 = vmul.f32 %v3483_v4, %v1898_v46 }
 0x35c   : > { %v1935_v39 = vsel %vm1934_vm7, %v1913_v7, %v1933_v5 }
 0x35d   : > { %1937 = vst [vmem:[%s220_s7] sm:$0xff] %v1935_v39 }
 0x35e   : > { %2163 = shalt.err (!%p2160_p3)
}
 0x35f   : > { %2073 = dma.vmem_to_hbm [thread:$0]  (%p2274_p5), %s1952_s8, 128, %s1954_s9, %s1939_s30  }
 0x360 PF: > { %p2079_p4 = scmp.ge.s32.totalorder %s2198_s21, 2  ;;  %s1965_s22 = sand.u32 1, %s2186_s18  }
 0x361   : > { %s1966_s10 = scalar_lea.sflag [#allocation3], %s1965_s22 }
 0x362   : > { %p2076_p7 = pnand %p2079_p4, %p2278_p6 }
 0x364   : > { %p2077_p8 = pneg %p2076_p7 }
 0x366   : > { %2181 = dma.done.wait (%p2077_p8), %s1966_s10, 128  }
 0x367   : > { %2183 = vsyncadd (%p2077_p8), %s1966_s10, 4294967168  ;;  %p15_p9 = scmp.ge.s32.totalorder %s2262_s24, 4   ;;  %s3536_s18 = smov %s2190_s19 }
 0x368   : > { %s3537_s19 = smov %s2194_s20  ;;  %s3538_s20 = smov %s2272_s27 }
 0x369   : > { %s3539_s21 = smov %s2262_s24  ;;  %17 = sbr.rel (!%p15_p9) target bundleno = 3 (0x3), region = 75 }
 0x36e   :  { %1972 = vsyncpa [#allocation3], 1 }
 0x36f   :  { %1974 = vsyncpa [#allocation3 + $0x1], 1 }

</bundles_post_ra>
